<compile_context>
chip_gen: v7x
topology: tpu7x:2x2x1
jax: 0.10.0
libtpu: 0.0.40
codegen_flags: <defaults>
</compile_context>

<pallas_src>
import functools
import math

import numpy as np
import jax
import jax.numpy as jnp
from jax.experimental import pallas as pl
from jax.experimental.pallas import tpu as pltpu

LANES = 128  # padded lane width of every gate tile (4H = 40 <= 128 -> one vreg)


def lstm_kernel(x_ref, wpk_ref, cpk_ref, out_ref, *, hidden_size, seq_len):
    """Full 2-layer LSTM recurrence + final linear in one grid-less invocation.

    x_ref   : (T, B, 1)  f32   raw input, time-major
    wpk_ref : (64, 128)  bf16  packed matmul weights, gate cols in [f,i,g,o] order,
                               zero-padded to 128 lanes, 16-row-aligned blocks:
                 rows  0:H   whh0  (layer-0 recurrent)
                 rows 16:16+H w1_ih (layer-1 input)
                 rows 32:32+H w1_hh (layer-1 recurrent)
                 rows 48:48+H wlin  (final linear, lane 0 only)
    cpk_ref : (8, 128)   f32   packed elementwise constants:
                 row 0 w_ih0 row (input_size=1), row 1 b0, row 2 b1, row 3 b_lin
    out_ref : (B, 1)     f32
    """
    H = hidden_size
    B = x_ref.shape[1]
    f32 = jnp.float32
    bf16 = jnp.bfloat16

    # ---- one-time (hoisted) weight reads & bias broadcasts ---------------------
    whh0 = wpk_ref[0:H, :]            # (H, 128) bf16
    w1_ih = wpk_ref[16:16 + H, :]     # (H, 128) bf16
    w1_hh = wpk_ref[32:32 + H, :]     # (H, 128) bf16
    wlin = wpk_ref[48:48 + H, :]      # (H, 128) bf16

    w0_row = jnp.broadcast_to(cpk_ref[0:1, :], (B, LANES))   # f32, hoisted broadcasts
    b0 = jnp.broadcast_to(cpk_ref[1:2, :], (B, LANES))
    b1 = jnp.broadcast_to(cpk_ref[2:3, :], (B, LANES))
    blin = jnp.broadcast_to(cpk_ref[3:4, :], (B, LANES))

    def gates(z, c):
        # One sigmoid + one tanh over the whole (B, 128) tile (single vreg each);
        # gate order [f, i, g, o]: the forget gate is already lane-aligned with c.
        s = jax.nn.sigmoid(z)
        th = jnp.tanh(z)
        f_g = s[:, 0 * H:1 * H]
        i_g = s[:, 1 * H:2 * H]
        g_g = th[:, 2 * H:3 * H]
        o_g = s[:, 3 * H:4 * H]
        c_new = f_g * c + i_g * g_g
        h_new = o_g * jnp.tanh(c_new)
        return h_new, c_new

    h0 = jnp.zeros((B, H), f32)
    c0 = jnp.zeros((B, H), f32)
    h1 = jnp.zeros((B, H), f32)
    c1 = jnp.zeros((B, H), f32)

    # Fully unrolled static time loop (seq_len small & static) so the LLO scheduler
    # can overlap layer-1 of step t with layer-0 of step t+1.
    for t in range(seq_len):
        # Layer-0 input projection (input_size == 1): VPU multiply-add, off the
        # h0-recurrence critical path.
        x_in = x_ref[t] * w0_row + b0                                  # (B, 128) f32
        # Layer-0 recurrent dot: bf16 operands, f32 accumulation -> single MXU pass.
        z0 = x_in + jnp.dot(h0.astype(bf16), whh0, preferred_element_type=f32)
        h0, c0 = gates(z0, c0)
        # TODO(synk): nn.LSTM applies dropout(p=0.3) to h0 here in train mode;
        # eval-mode semantics (dropout = identity) are implemented.
        # Layer 1: two independent small dots (no lane-offset concatenate).
        h0b = h0.astype(bf16)
        z1 = (jnp.dot(h0b, w1_ih, preferred_element_type=f32)
              + jnp.dot(h1.astype(bf16), w1_hh, preferred_element_type=f32)
              + b1)
        h1, c1 = gates(z1, c1)

    # Final linear on the last timestep's top-layer hidden state.
    out_full = jnp.dot(h1.astype(bf16), wlin, preferred_element_type=f32) + blin
    out_ref[...] = out_full[:, 0:1]


def init_params(key, input_size=1, hidden_size=10):
    """Deterministic params, PyTorch-style shapes & uniform(-1/sqrt(H), 1/sqrt(H)) init."""
    H = hidden_size
    bound = 1.0 / math.sqrt(H)
    keys = jax.random.split(key, 10)
    u = lambda k_, shape: jax.random.uniform(k_, shape, jnp.float32, -bound, bound)
    return {
        "w_ih_l0": u(keys[0], (4 * H, input_size)),
        "w_hh_l0": u(keys[1], (4 * H, H)),
        "b_ih_l0": u(keys[2], (4 * H,)),
        "b_hh_l0": u(keys[3], (4 * H,)),
        "w_ih_l1": u(keys[4], (4 * H, H)),
        "w_hh_l1": u(keys[5], (4 * H, H)),
        "b_ih_l1": u(keys[6], (4 * H,)),
        "b_hh_l1": u(keys[7], (4 * H,)),
        "w_lin":   u(keys[8], (1, H)),
        "b_lin":   u(keys[9], (1,)),
    }


def _gate_perm(H):
    # PyTorch gate order is (i, f, g, o); reorder columns to (f, i, g, o) so the
    # forget gate lands in lanes 0:H.  Compile-time permutation, zero runtime cost.
    return np.concatenate([np.arange(H, 2 * H), np.arange(0, H),
                           np.arange(2 * H, 3 * H), np.arange(3 * H, 4 * H)])


@functools.partial(jax.jit, static_argnames=("hidden_size",))
def lstm_forward(x, params, hidden_size=10):
    B, T, _ = x.shape
    H = hidden_size
    assert 4 * H <= 128 and H <= 16, "packed-buffer layout assumes H <= 16"
    perm = _gate_perm(H)  # static numpy permutation

    x_t = jnp.transpose(x.astype(jnp.float32), (1, 0, 2))             # (T, B, 1)

    # Packed bf16 matmul weights: 16-row-aligned blocks, gate cols permuted,
    # zero-padded to 128 lanes (garbage lanes of z stay exactly 0).
    wpk = jnp.zeros((64, 128), jnp.float32)
    wpk = wpk.at[0:H, 0:4 * H].set(params["w_hh_l0"][perm].T)
    wpk = wpk.at[16:16 + H, 0:4 * H].set(params["w_ih_l1"][perm].T)
    wpk = wpk.at[32:32 + H, 0:4 * H].set(params["w_hh_l1"][perm].T)
    wpk = wpk.at[48:48 + H, 0:1].set(params["w_lin"].T)
    wpk = wpk.astype(jnp.bfloat16)

    # Packed f32 elementwise constants (kept f32: biases / gate math stay f32).
    cpk = jnp.zeros((8, 128), jnp.float32)
    cpk = cpk.at[0, 0:4 * H].set(params["w_ih_l0"][perm, 0])
    cpk = cpk.at[1, 0:4 * H].set((params["b_ih_l0"] + params["b_hh_l0"])[perm])
    cpk = cpk.at[2, 0:4 * H].set((params["b_ih_l1"] + params["b_hh_l1"])[perm])
    cpk = cpk.at[3, 0].set(params["b_lin"][0])

    kernel = functools.partial(lstm_kernel, hidden_size=H, seq_len=T)
    vmem = pl.BlockSpec(memory_space=pltpu.MemorySpace.VMEM)

    # Grid-less single-TensorCore call: footprint < 100 KiB, latency-bound serial
    # recurrence -> no T grid, no batch grid, no second core.
    out = pl.pallas_call(
        kernel,
        out_shape=jax.ShapeDtypeStruct((B, 1), jnp.float32),
        in_specs=[vmem, vmem, vmem],
        out_specs=vmem,
    )(x_t, wpk, cpk)
    return out


def lstm_forward_ref(x, params, hidden_size=10):
    """Pure-JAX f32 reference (eval-mode, matches PyTorch nn.LSTM + Linear)."""
    H = hidden_size
    B, T, _ = x.shape
    b0 = params["b_ih_l0"] + params["b_hh_l0"]
    b1 = params["b_ih_l1"] + params["b_hh_l1"]

    def cell(x_t, h, c, w_ih, w_hh, b):
        z = x_t @ w_ih.T + h @ w_hh.T + b
        i_g = jax.nn.sigmoid(z[:, 0 * H:1 * H])
        f_g = jax.nn.sigmoid(z[:, 1 * H:2 * H])
        g_g = jnp.tanh(z[:, 2 * H:3 * H])
        o_g = jax.nn.sigmoid(z[:, 3 * H:4 * H])
        c_new = f_g * c + i_g * g_g
        return o_g * jnp.tanh(c_new), c_new

    h0 = c0 = h1 = c1 = jnp.zeros((B, H), jnp.float32)
    for t in range(T):
        h0, c0 = cell(x[:, t, :], h0, c0, params["w_ih_l0"], params["w_hh_l0"], b0)
        h1, c1 = cell(h0, h1, c1, params["w_ih_l1"], params["w_hh_l1"], b1)
    return h1 @ params["w_lin"].T + params["b_lin"]


if __name__ == "__main__":
    INPUT_SIZE, HIDDEN_SIZE = 1, 10
    BATCH, SEQ = 2, 8

    key = jax.random.PRNGKey(0)
    k_x, k_p = jax.random.split(key)
    x = jax.random.normal(k_x, (BATCH, SEQ, INPUT_SIZE), jnp.float32)
    params = init_params(k_p, INPUT_SIZE, HIDDEN_SIZE)

    out = lstm_forward(x, params, hidden_size=HIDDEN_SIZE)
    out = jax.block_until_ready(out)

    ref = lstm_forward_ref(x, params, hidden_size=HIDDEN_SIZE)
    np.testing.assert_allclose(np.asarray(out), np.asarray(ref), rtol=1e-2, atol=1e-2)

    print("KERNEL_OK")
</pallas_src>

<mosaic_0001>
module attributes {stable_mosaic.version = 11 : i64} {
  func.func @lstm_kernel(%arg0: memref<8x2x1xf32, #tpu.memory_space<vmem>>, %arg1: memref<64x128xbf16, #tpu.memory_space<vmem>>, %arg2: memref<8x128xf32, #tpu.memory_space<vmem>>, %arg3: memref<2x1xf32, #tpu.memory_space<vmem>>) attributes {dimension_semantics = [], scalar_prefetch = 0 : i64, scratch_operands = 0 : i64, tpu.core_type = #tpu.core_type<tc>} {
    %c0 = arith.constant 0 : index
    %c0_0 = arith.constant 0 : index
    %0 = vector.load %arg1[%c0, %c0_0] : memref<64x128xbf16, #tpu.memory_space<vmem>>, vector<10x128xbf16>
    %c16 = arith.constant 16 : index
    %c0_1 = arith.constant 0 : index
    %1 = vector.load %arg1[%c16, %c0_1] : memref<64x128xbf16, #tpu.memory_space<vmem>>, vector<10x128xbf16>
    %c32 = arith.constant 32 : index
    %c0_2 = arith.constant 0 : index
    %2 = vector.load %arg1[%c32, %c0_2] : memref<64x128xbf16, #tpu.memory_space<vmem>>, vector<10x128xbf16>
    %c48 = arith.constant 48 : index
    %c0_3 = arith.constant 0 : index
    %3 = vector.load %arg1[%c48, %c0_3] : memref<64x128xbf16, #tpu.memory_space<vmem>>, vector<10x128xbf16>
    %c0_4 = arith.constant 0 : index
    %c0_5 = arith.constant 0 : index
    %4 = vector.load %arg2[%c0_4, %c0_5] : memref<8x128xf32, #tpu.memory_space<vmem>>, vector<1x128xf32>
    %5 = vector.shape_cast %4 : vector<1x128xf32> to vector<1x128xf32>
    %6 = vector.broadcast %5 : vector<1x128xf32> to vector<2x128xf32>
    %c1 = arith.constant 1 : index
    %c0_6 = arith.constant 0 : index
    %7 = vector.load %arg2[%c1, %c0_6] : memref<8x128xf32, #tpu.memory_space<vmem>>, vector<1x128xf32>
    %8 = vector.shape_cast %7 : vector<1x128xf32> to vector<1x128xf32>
    %9 = vector.broadcast %8 : vector<1x128xf32> to vector<2x128xf32>
    %c2 = arith.constant 2 : index
    %c0_7 = arith.constant 0 : index
    %10 = vector.load %arg2[%c2, %c0_7] : memref<8x128xf32, #tpu.memory_space<vmem>>, vector<1x128xf32>
    %11 = vector.shape_cast %10 : vector<1x128xf32> to vector<1x128xf32>
    %12 = vector.broadcast %11 : vector<1x128xf32> to vector<2x128xf32>
    %c3 = arith.constant 3 : index
    %c0_8 = arith.constant 0 : index
    %13 = vector.load %arg2[%c3, %c0_8] : memref<8x128xf32, #tpu.memory_space<vmem>>, vector<1x128xf32>
    %14 = vector.shape_cast %13 : vector<1x128xf32> to vector<1x128xf32>
    %15 = vector.broadcast %14 : vector<1x128xf32> to vector<2x128xf32>
    %cst = arith.constant 0.000000e+00 : f32
    %16 = vector.broadcast %cst : f32 to vector<2x10xf32>
    %cst_9 = arith.constant 0.000000e+00 : f32
    %17 = vector.broadcast %cst_9 : f32 to vector<2x10xf32>
    %cst_10 = arith.constant 0.000000e+00 : f32
    %18 = vector.broadcast %cst_10 : f32 to vector<2x10xf32>
    %cst_11 = arith.constant 0.000000e+00 : f32
    %19 = vector.broadcast %cst_11 : f32 to vector<2x10xf32>
    %c0_12 = arith.constant 0 : index
    %c0_13 = arith.constant 0 : index
    %c0_14 = arith.constant 0 : index
    %20 = vector.load %arg0[%c0_12, %c0_13, %c0_14] : memref<8x2x1xf32, #tpu.memory_space<vmem>>, vector<1x2x1xf32>
    %21 = vector.shape_cast %20 : vector<1x2x1xf32> to vector<2x1xf32>
    %22 = vector.broadcast %21 : vector<2x1xf32> to vector<2x128xf32>
    %23 = arith.mulf %22, %6 : vector<2x128xf32>
    %24 = arith.addf %23, %9 : vector<2x128xf32>
    %25 = arith.truncf %16 : vector<2x10xf32> to vector<2x10xbf16>
    %cst_15 = arith.constant dense<0.000000e+00> : vector<2x128xf32>
    %26 = tpu.matmul %25, %0, %cst_15 {dimension_numbers = #tpu.dot_dimension_numbers<[1], [0], [0], [1], [0, 0, 1, 1], [], []>} : vector<2x10xbf16>, vector<10x128xbf16>, vector<2x128xf32> -> vector<2x128xf32>
    %27 = arith.addf %24, %26 : vector<2x128xf32>
    %28 = arith.negf %27 : vector<2x128xf32>
    %29 = math.exp %28 : vector<2x128xf32>
    %cst_16 = arith.constant 1.000000e+00 : f32
    %30 = vector.broadcast %cst_16 : f32 to vector<2x128xf32>
    %31 = arith.addf %30, %29 : vector<2x128xf32>
    %32 = arith.divf %30, %31 : vector<2x128xf32>
    %33 = math.tanh %27 : vector<2x128xf32>
    %34 = vector.extract_strided_slice %32 {offsets = [0, 0], sizes = [2, 10], strides = [1, 1]} : vector<2x128xf32> to vector<2x10xf32>
    %35 = vector.extract_strided_slice %32 {offsets = [0, 10], sizes = [2, 10], strides = [1, 1]} : vector<2x128xf32> to vector<2x10xf32>
    %36 = vector.extract_strided_slice %33 {offsets = [0, 20], sizes = [2, 10], strides = [1, 1]} : vector<2x128xf32> to vector<2x10xf32>
    %37 = vector.extract_strided_slice %32 {offsets = [0, 30], sizes = [2, 10], strides = [1, 1]} : vector<2x128xf32> to vector<2x10xf32>
    %38 = arith.mulf %34, %17 : vector<2x10xf32>
    %39 = arith.mulf %35, %36 : vector<2x10xf32>
    %40 = arith.addf %38, %39 : vector<2x10xf32>
    %41 = math.tanh %40 : vector<2x10xf32>
    %42 = arith.mulf %37, %41 : vector<2x10xf32>
    %43 = arith.truncf %42 : vector<2x10xf32> to vector<2x10xbf16>
    %cst_17 = arith.constant dense<0.000000e+00> : vector<2x128xf32>
    %44 = tpu.matmul %43, %1, %cst_17 {dimension_numbers = #tpu.dot_dimension_numbers<[1], [0], [0], [1], [0, 0, 1, 1], [], []>} : vector<2x10xbf16>, vector<10x128xbf16>, vector<2x128xf32> -> vector<2x128xf32>
    %45 = arith.truncf %18 : vector<2x10xf32> to vector<2x10xbf16>
    %cst_18 = arith.constant dense<0.000000e+00> : vector<2x128xf32>
    %46 = tpu.matmul %45, %2, %cst_18 {dimension_numbers = #tpu.dot_dimension_numbers<[1], [0], [0], [1], [0, 0, 1, 1], [], []>} : vector<2x10xbf16>, vector<10x128xbf16>, vector<2x128xf32> -> vector<2x128xf32>
    %47 = arith.addf %44, %46 : vector<2x128xf32>
    %48 = arith.addf %47, %12 : vector<2x128xf32>
    %49 = arith.negf %48 : vector<2x128xf32>
    %50 = math.exp %49 : vector<2x128xf32>
    %cst_19 = arith.constant 1.000000e+00 : f32
    %51 = vector.broadcast %cst_19 : f32 to vector<2x128xf32>
    %52 = arith.addf %51, %50 : vector<2x128xf32>
    %53 = arith.divf %51, %52 : vector<2x128xf32>
    %54 = math.tanh %48 : vector<2x128xf32>
    %55 = vector.extract_strided_slice %53 {offsets = [0, 0], sizes = [2, 10], strides = [1, 1]} : vector<2x128xf32> to vector<2x10xf32>
    %56 = vector.extract_strided_slice %53 {offsets = [0, 10], sizes = [2, 10], strides = [1, 1]} : vector<2x128xf32> to vector<2x10xf32>
    %57 = vector.extract_strided_slice %54 {offsets = [0, 20], sizes = [2, 10], strides = [1, 1]} : vector<2x128xf32> to vector<2x10xf32>
    %58 = vector.extract_strided_slice %53 {offsets = [0, 30], sizes = [2, 10], strides = [1, 1]} : vector<2x128xf32> to vector<2x10xf32>
    %59 = arith.mulf %55, %19 : vector<2x10xf32>
    %60 = arith.mulf %56, %57 : vector<2x10xf32>
    %61 = arith.addf %59, %60 : vector<2x10xf32>
    %62 = math.tanh %61 : vector<2x10xf32>
    %63 = arith.mulf %58, %62 : vector<2x10xf32>
    %c1_20 = arith.constant 1 : index
    %c0_21 = arith.constant 0 : index
    %c0_22 = arith.constant 0 : index
    %64 = vector.load %arg0[%c1_20, %c0_21, %c0_22] : memref<8x2x1xf32, #tpu.memory_space<vmem>>, vector<1x2x1xf32>
    %65 = vector.shape_cast %64 : vector<1x2x1xf32> to vector<2x1xf32>
    %66 = vector.broadcast %65 : vector<2x1xf32> to vector<2x128xf32>
    %67 = arith.mulf %66, %6 : vector<2x128xf32>
    %68 = arith.addf %67, %9 : vector<2x128xf32>
    %69 = arith.truncf %42 : vector<2x10xf32> to vector<2x10xbf16>
    %cst_23 = arith.constant dense<0.000000e+00> : vector<2x128xf32>
    %70 = tpu.matmul %69, %0, %cst_23 {dimension_numbers = #tpu.dot_dimension_numbers<[1], [0], [0], [1], [0, 0, 1, 1], [], []>} : vector<2x10xbf16>, vector<10x128xbf16>, vector<2x128xf32> -> vector<2x128xf32>
    %71 = arith.addf %68, %70 : vector<2x128xf32>
    %72 = arith.negf %71 : vector<2x128xf32>
    %73 = math.exp %72 : vector<2x128xf32>
    %cst_24 = arith.constant 1.000000e+00 : f32
    %74 = vector.broadcast %cst_24 : f32 to vector<2x128xf32>
    %75 = arith.addf %74, %73 : vector<2x128xf32>
    %76 = arith.divf %74, %75 : vector<2x128xf32>
    %77 = math.tanh %71 : vector<2x128xf32>
    %78 = vector.extract_strided_slice %76 {offsets = [0, 0], sizes = [2, 10], strides = [1, 1]} : vector<2x128xf32> to vector<2x10xf32>
    %79 = vector.extract_strided_slice %76 {offsets = [0, 10], sizes = [2, 10], strides = [1, 1]} : vector<2x128xf32> to vector<2x10xf32>
    %80 = vector.extract_strided_slice %77 {offsets = [0, 20], sizes = [2, 10], strides = [1, 1]} : vector<2x128xf32> to vector<2x10xf32>
    %81 = vector.extract_strided_slice %76 {offsets = [0, 30], sizes = [2, 10], strides = [1, 1]} : vector<2x128xf32> to vector<2x10xf32>
    %82 = arith.mulf %78, %40 : vector<2x10xf32>
    %83 = arith.mulf %79, %80 : vector<2x10xf32>
    %84 = arith.addf %82, %83 : vector<2x10xf32>
    %85 = math.tanh %84 : vector<2x10xf32>
    %86 = arith.mulf %81, %85 : vector<2x10xf32>
    %87 = arith.truncf %86 : vector<2x10xf32> to vector<2x10xbf16>
    %cst_25 = arith.constant dense<0.000000e+00> : vector<2x128xf32>
    %88 = tpu.matmul %87, %1, %cst_25 {dimension_numbers = #tpu.dot_dimension_numbers<[1], [0], [0], [1], [0, 0, 1, 1], [], []>} : vector<2x10xbf16>, vector<10x128xbf16>, vector<2x128xf32> -> vector<2x128xf32>
    %89 = arith.truncf %63 : vector<2x10xf32> to vector<2x10xbf16>
    %cst_26 = arith.constant dense<0.000000e+00> : vector<2x128xf32>
    %90 = tpu.matmul %89, %2, %cst_26 {dimension_numbers = #tpu.dot_dimension_numbers<[1], [0], [0], [1], [0, 0, 1, 1], [], []>} : vector<2x10xbf16>, vector<10x128xbf16>, vector<2x128xf32> -> vector<2x128xf32>
    %91 = arith.addf %88, %90 : vector<2x128xf32>
    %92 = arith.addf %91, %12 : vector<2x128xf32>
    %93 = arith.negf %92 : vector<2x128xf32>
    %94 = math.exp %93 : vector<2x128xf32>
    %cst_27 = arith.constant 1.000000e+00 : f32
    %95 = vector.broadcast %cst_27 : f32 to vector<2x128xf32>
    %96 = arith.addf %95, %94 : vector<2x128xf32>
    %97 = arith.divf %95, %96 : vector<2x128xf32>
    %98 = math.tanh %92 : vector<2x128xf32>
    %99 = vector.extract_strided_slice %97 {offsets = [0, 0], sizes = [2, 10], strides = [1, 1]} : vector<2x128xf32> to vector<2x10xf32>
    %100 = vector.extract_strided_slice %97 {offsets = [0, 10], sizes = [2, 10], strides = [1, 1]} : vector<2x128xf32> to vector<2x10xf32>
    %101 = vector.extract_strided_slice %98 {offsets = [0, 20], sizes = [2, 10], strides = [1, 1]} : vector<2x128xf32> to vector<2x10xf32>
    %102 = vector.extract_strided_slice %97 {offsets = [0, 30], sizes = [2, 10], strides = [1, 1]} : vector<2x128xf32> to vector<2x10xf32>
    %103 = arith.mulf %99, %61 : vector<2x10xf32>
    %104 = arith.mulf %100, %101 : vector<2x10xf32>
    %105 = arith.addf %103, %104 : vector<2x10xf32>
    %106 = math.tanh %105 : vector<2x10xf32>
    %107 = arith.mulf %102, %106 : vector<2x10xf32>
    %c2_28 = arith.constant 2 : index
    %c0_29 = arith.constant 0 : index
    %c0_30 = arith.constant 0 : index
    %108 = vector.load %arg0[%c2_28, %c0_29, %c0_30] : memref<8x2x1xf32, #tpu.memory_space<vmem>>, vector<1x2x1xf32>
    %109 = vector.shape_cast %108 : vector<1x2x1xf32> to vector<2x1xf32>
    %110 = vector.broadcast %109 : vector<2x1xf32> to vector<2x128xf32>
    %111 = arith.mulf %110, %6 : vector<2x128xf32>
    %112 = arith.addf %111, %9 : vector<2x128xf32>
    %113 = arith.truncf %86 : vector<2x10xf32> to vector<2x10xbf16>
    %cst_31 = arith.constant dense<0.000000e+00> : vector<2x128xf32>
    %114 = tpu.matmul %113, %0, %cst_31 {dimension_numbers = #tpu.dot_dimension_numbers<[1], [0], [0], [1], [0, 0, 1, 1], [], []>} : vector<2x10xbf16>, vector<10x128xbf16>, vector<2x128xf32> -> vector<2x128xf32>
    %115 = arith.addf %112, %114 : vector<2x128xf32>
    %116 = arith.negf %115 : vector<2x128xf32>
    %117 = math.exp %116 : vector<2x128xf32>
    %cst_32 = arith.constant 1.000000e+00 : f32
    %118 = vector.broadcast %cst_32 : f32 to vector<2x128xf32>
    %119 = arith.addf %118, %117 : vector<2x128xf32>
    %120 = arith.divf %118, %119 : vector<2x128xf32>
    %121 = math.tanh %115 : vector<2x128xf32>
    %122 = vector.extract_strided_slice %120 {offsets = [0, 0], sizes = [2, 10], strides = [1, 1]} : vector<2x128xf32> to vector<2x10xf32>
    %123 = vector.extract_strided_slice %120 {offsets = [0, 10], sizes = [2, 10], strides = [1, 1]} : vector<2x128xf32> to vector<2x10xf32>
    %124 = vector.extract_strided_slice %121 {offsets = [0, 20], sizes = [2, 10], strides = [1, 1]} : vector<2x128xf32> to vector<2x10xf32>
    %125 = vector.extract_strided_slice %120 {offsets = [0, 30], sizes = [2, 10], strides = [1, 1]} : vector<2x128xf32> to vector<2x10xf32>
    %126 = arith.mulf %122, %84 : vector<2x10xf32>
    %127 = arith.mulf %123, %124 : vector<2x10xf32>
    %128 = arith.addf %126, %127 : vector<2x10xf32>
    %129 = math.tanh %128 : vector<2x10xf32>
    %130 = arith.mulf %125, %129 : vector<2x10xf32>
    %131 = arith.truncf %130 : vector<2x10xf32> to vector<2x10xbf16>
    %cst_33 = arith.constant dense<0.000000e+00> : vector<2x128xf32>
    %132 = tpu.matmul %131, %1, %cst_33 {dimension_numbers = #tpu.dot_dimension_numbers<[1], [0], [0], [1], [0, 0, 1, 1], [], []>} : vector<2x10xbf16>, vector<10x128xbf16>, vector<2x128xf32> -> vector<2x128xf32>
    %133 = arith.truncf %107 : vector<2x10xf32> to vector<2x10xbf16>
    %cst_34 = arith.constant dense<0.000000e+00> : vector<2x128xf32>
    %134 = tpu.matmul %133, %2, %cst_34 {dimension_numbers = #tpu.dot_dimension_numbers<[1], [0], [0], [1], [0, 0, 1, 1], [], []>} : vector<2x10xbf16>, vector<10x128xbf16>, vector<2x128xf32> -> vector<2x128xf32>
    %135 = arith.addf %132, %134 : vector<2x128xf32>
    %136 = arith.addf %135, %12 : vector<2x128xf32>
    %137 = arith.negf %136 : vector<2x128xf32>
    %138 = math.exp %137 : vector<2x128xf32>
    %cst_35 = arith.constant 1.000000e+00 : f32
    %139 = vector.broadcast %cst_35 : f32 to vector<2x128xf32>
    %140 = arith.addf %139, %138 : vector<2x128xf32>
    %141 = arith.divf %139, %140 : vector<2x128xf32>
    %142 = math.tanh %136 : vector<2x128xf32>
    %143 = vector.extract_strided_slice %141 {offsets = [0, 0], sizes = [2, 10], strides = [1, 1]} : vector<2x128xf32> to vector<2x10xf32>
    %144 = vector.extract_strided_slice %141 {offsets = [0, 10], sizes = [2, 10], strides = [1, 1]} : vector<2x128xf32> to vector<2x10xf32>
    %145 = vector.extract_strided_slice %142 {offsets = [0, 20], sizes = [2, 10], strides = [1, 1]} : vector<2x128xf32> to vector<2x10xf32>
    %146 = vector.extract_strided_slice %141 {offsets = [0, 30], sizes = [2, 10], strides = [1, 1]} : vector<2x128xf32> to vector<2x10xf32>
    %147 = arith.mulf %143, %105 : vector<2x10xf32>
    %148 = arith.mulf %144, %145 : vector<2x10xf32>
    %149 = arith.addf %147, %148 : vector<2x10xf32>
    %150 = math.tanh %149 : vector<2x10xf32>
    %151 = arith.mulf %146, %150 : vector<2x10xf32>
    %c3_36 = arith.constant 3 : index
    %c0_37 = arith.constant 0 : index
    %c0_38 = arith.constant 0 : index
    %152 = vector.load %arg0[%c3_36, %c0_37, %c0_38] : memref<8x2x1xf32, #tpu.memory_space<vmem>>, vector<1x2x1xf32>
    %153 = vector.shape_cast %152 : vector<1x2x1xf32> to vector<2x1xf32>
    %154 = vector.broadcast %153 : vector<2x1xf32> to vector<2x128xf32>
    %155 = arith.mulf %154, %6 : vector<2x128xf32>
    %156 = arith.addf %155, %9 : vector<2x128xf32>
    %157 = arith.truncf %130 : vector<2x10xf32> to vector<2x10xbf16>
    %cst_39 = arith.constant dense<0.000000e+00> : vector<2x128xf32>
    %158 = tpu.matmul %157, %0, %cst_39 {dimension_numbers = #tpu.dot_dimension_numbers<[1], [0], [0], [1], [0, 0, 1, 1], [], []>} : vector<2x10xbf16>, vector<10x128xbf16>, vector<2x128xf32> -> vector<2x128xf32>
    %159 = arith.addf %156, %158 : vector<2x128xf32>
    %160 = arith.negf %159 : vector<2x128xf32>
    %161 = math.exp %160 : vector<2x128xf32>
    %cst_40 = arith.constant 1.000000e+00 : f32
    %162 = vector.broadcast %cst_40 : f32 to vector<2x128xf32>
    %163 = arith.addf %162, %161 : vector<2x128xf32>
    %164 = arith.divf %162, %163 : vector<2x128xf32>
    %165 = math.tanh %159 : vector<2x128xf32>
    %166 = vector.extract_strided_slice %164 {offsets = [0, 0], sizes = [2, 10], strides = [1, 1]} : vector<2x128xf32> to vector<2x10xf32>
    %167 = vector.extract_strided_slice %164 {offsets = [0, 10], sizes = [2, 10], strides = [1, 1]} : vector<2x128xf32> to vector<2x10xf32>
    %168 = vector.extract_strided_slice %165 {offsets = [0, 20], sizes = [2, 10], strides = [1, 1]} : vector<2x128xf32> to vector<2x10xf32>
    %169 = vector.extract_strided_slice %164 {offsets = [0, 30], sizes = [2, 10], strides = [1, 1]} : vector<2x128xf32> to vector<2x10xf32>
    %170 = arith.mulf %166, %128 : vector<2x10xf32>
    %171 = arith.mulf %167, %168 : vector<2x10xf32>
    %172 = arith.addf %170, %171 : vector<2x10xf32>
    %173 = math.tanh %172 : vector<2x10xf32>
    %174 = arith.mulf %169, %173 : vector<2x10xf32>
    %175 = arith.truncf %174 : vector<2x10xf32> to vector<2x10xbf16>
    %cst_41 = arith.constant dense<0.000000e+00> : vector<2x128xf32>
    %176 = tpu.matmul %175, %1, %cst_41 {dimension_numbers = #tpu.dot_dimension_numbers<[1], [0], [0], [1], [0, 0, 1, 1], [], []>} : vector<2x10xbf16>, vector<10x128xbf16>, vector<2x128xf32> -> vector<2x128xf32>
    %177 = arith.truncf %151 : vector<2x10xf32> to vector<2x10xbf16>
    %cst_42 = arith.constant dense<0.000000e+00> : vector<2x128xf32>
    %178 = tpu.matmul %177, %2, %cst_42 {dimension_numbers = #tpu.dot_dimension_numbers<[1], [0], [0], [1], [0, 0, 1, 1], [], []>} : vector<2x10xbf16>, vector<10x128xbf16>, vector<2x128xf32> -> vector<2x128xf32>
    %179 = arith.addf %176, %178 : vector<2x128xf32>
    %180 = arith.addf %179, %12 : vector<2x128xf32>
    %181 = arith.negf %180 : vector<2x128xf32>
    %182 = math.exp %181 : vector<2x128xf32>
    %cst_43 = arith.constant 1.000000e+00 : f32
    %183 = vector.broadcast %cst_43 : f32 to vector<2x128xf32>
    %184 = arith.addf %183, %182 : vector<2x128xf32>
    %185 = arith.divf %183, %184 : vector<2x128xf32>
    %186 = math.tanh %180 : vector<2x128xf32>
    %187 = vector.extract_strided_slice %185 {offsets = [0, 0], sizes = [2, 10], strides = [1, 1]} : vector<2x128xf32> to vector<2x10xf32>
    %188 = vector.extract_strided_slice %185 {offsets = [0, 10], sizes = [2, 10], strides = [1, 1]} : vector<2x128xf32> to vector<2x10xf32>
    %189 = vector.extract_strided_slice %186 {offsets = [0, 20], sizes = [2, 10], strides = [1, 1]} : vector<2x128xf32> to vector<2x10xf32>
    %190 = vector.extract_strided_slice %185 {offsets = [0, 30], sizes = [2, 10], strides = [1, 1]} : vector<2x128xf32> to vector<2x10xf32>
    %191 = arith.mulf %187, %149 : vector<2x10xf32>
    %192 = arith.mulf %188, %189 : vector<2x10xf32>
    %193 = arith.addf %191, %192 : vector<2x10xf32>
    %194 = math.tanh %193 : vector<2x10xf32>
    %195 = arith.mulf %190, %194 : vector<2x10xf32>
    %c4 = arith.constant 4 : index
    %c0_44 = arith.constant 0 : index
    %c0_45 = arith.constant 0 : index
    %196 = vector.load %arg0[%c4, %c0_44, %c0_45] : memref<8x2x1xf32, #tpu.memory_space<vmem>>, vector<1x2x1xf32>
    %197 = vector.shape_cast %196 : vector<1x2x1xf32> to vector<2x1xf32>
    %198 = vector.broadcast %197 : vector<2x1xf32> to vector<2x128xf32>
    %199 = arith.mulf %198, %6 : vector<2x128xf32>
    %200 = arith.addf %199, %9 : vector<2x128xf32>
    %201 = arith.truncf %174 : vector<2x10xf32> to vector<2x10xbf16>
    %cst_46 = arith.constant dense<0.000000e+00> : vector<2x128xf32>
    %202 = tpu.matmul %201, %0, %cst_46 {dimension_numbers = #tpu.dot_dimension_numbers<[1], [0], [0], [1], [0, 0, 1, 1], [], []>} : vector<2x10xbf16>, vector<10x128xbf16>, vector<2x128xf32> -> vector<2x128xf32>
    %203 = arith.addf %200, %202 : vector<2x128xf32>
    %204 = arith.negf %203 : vector<2x128xf32>
    %205 = math.exp %204 : vector<2x128xf32>
    %cst_47 = arith.constant 1.000000e+00 : f32
    %206 = vector.broadcast %cst_47 : f32 to vector<2x128xf32>
    %207 = arith.addf %206, %205 : vector<2x128xf32>
    %208 = arith.divf %206, %207 : vector<2x128xf32>
    %209 = math.tanh %203 : vector<2x128xf32>
    %210 = vector.extract_strided_slice %208 {offsets = [0, 0], sizes = [2, 10], strides = [1, 1]} : vector<2x128xf32> to vector<2x10xf32>
    %211 = vector.extract_strided_slice %208 {offsets = [0, 10], sizes = [2, 10], strides = [1, 1]} : vector<2x128xf32> to vector<2x10xf32>
    %212 = vector.extract_strided_slice %209 {offsets = [0, 20], sizes = [2, 10], strides = [1, 1]} : vector<2x128xf32> to vector<2x10xf32>
    %213 = vector.extract_strided_slice %208 {offsets = [0, 30], sizes = [2, 10], strides = [1, 1]} : vector<2x128xf32> to vector<2x10xf32>
    %214 = arith.mulf %210, %172 : vector<2x10xf32>
    %215 = arith.mulf %211, %212 : vector<2x10xf32>
    %216 = arith.addf %214, %215 : vector<2x10xf32>
    %217 = math.tanh %216 : vector<2x10xf32>
    %218 = arith.mulf %213, %217 : vector<2x10xf32>
    %219 = arith.truncf %218 : vector<2x10xf32> to vector<2x10xbf16>
    %cst_48 = arith.constant dense<0.000000e+00> : vector<2x128xf32>
    %220 = tpu.matmul %219, %1, %cst_48 {dimension_numbers = #tpu.dot_dimension_numbers<[1], [0], [0], [1], [0, 0, 1, 1], [], []>} : vector<2x10xbf16>, vector<10x128xbf16>, vector<2x128xf32> -> vector<2x128xf32>
    %221 = arith.truncf %195 : vector<2x10xf32> to vector<2x10xbf16>
    %cst_49 = arith.constant dense<0.000000e+00> : vector<2x128xf32>
    %222 = tpu.matmul %221, %2, %cst_49 {dimension_numbers = #tpu.dot_dimension_numbers<[1], [0], [0], [1], [0, 0, 1, 1], [], []>} : vector<2x10xbf16>, vector<10x128xbf16>, vector<2x128xf32> -> vector<2x128xf32>
    %223 = arith.addf %220, %222 : vector<2x128xf32>
    %224 = arith.addf %223, %12 : vector<2x128xf32>
    %225 = arith.negf %224 : vector<2x128xf32>
    %226 = math.exp %225 : vector<2x128xf32>
    %cst_50 = arith.constant 1.000000e+00 : f32
    %227 = vector.broadcast %cst_50 : f32 to vector<2x128xf32>
    %228 = arith.addf %227, %226 : vector<2x128xf32>
    %229 = arith.divf %227, %228 : vector<2x128xf32>
    %230 = math.tanh %224 : vector<2x128xf32>
    %231 = vector.extract_strided_slice %229 {offsets = [0, 0], sizes = [2, 10], strides = [1, 1]} : vector<2x128xf32> to vector<2x10xf32>
    %232 = vector.extract_strided_slice %229 {offsets = [0, 10], sizes = [2, 10], strides = [1, 1]} : vector<2x128xf32> to vector<2x10xf32>
    %233 = vector.extract_strided_slice %230 {offsets = [0, 20], sizes = [2, 10], strides = [1, 1]} : vector<2x128xf32> to vector<2x10xf32>
    %234 = vector.extract_strided_slice %229 {offsets = [0, 30], sizes = [2, 10], strides = [1, 1]} : vector<2x128xf32> to vector<2x10xf32>
    %235 = arith.mulf %231, %193 : vector<2x10xf32>
    %236 = arith.mulf %232, %233 : vector<2x10xf32>
    %237 = arith.addf %235, %236 : vector<2x10xf32>
    %238 = math.tanh %237 : vector<2x10xf32>
    %239 = arith.mulf %234, %238 : vector<2x10xf32>
    %c5 = arith.constant 5 : index
    %c0_51 = arith.constant 0 : index
    %c0_52 = arith.constant 0 : index
    %240 = vector.load %arg0[%c5, %c0_51, %c0_52] : memref<8x2x1xf32, #tpu.memory_space<vmem>>, vector<1x2x1xf32>
    %241 = vector.shape_cast %240 : vector<1x2x1xf32> to vector<2x1xf32>
    %242 = vector.broadcast %241 : vector<2x1xf32> to vector<2x128xf32>
    %243 = arith.mulf %242, %6 : vector<2x128xf32>
    %244 = arith.addf %243, %9 : vector<2x128xf32>
    %245 = arith.truncf %218 : vector<2x10xf32> to vector<2x10xbf16>
    %cst_53 = arith.constant dense<0.000000e+00> : vector<2x128xf32>
    %246 = tpu.matmul %245, %0, %cst_53 {dimension_numbers = #tpu.dot_dimension_numbers<[1], [0], [0], [1], [0, 0, 1, 1], [], []>} : vector<2x10xbf16>, vector<10x128xbf16>, vector<2x128xf32> -> vector<2x128xf32>
    %247 = arith.addf %244, %246 : vector<2x128xf32>
    %248 = arith.negf %247 : vector<2x128xf32>
    %249 = math.exp %248 : vector<2x128xf32>
    %cst_54 = arith.constant 1.000000e+00 : f32
    %250 = vector.broadcast %cst_54 : f32 to vector<2x128xf32>
    %251 = arith.addf %250, %249 : vector<2x128xf32>
    %252 = arith.divf %250, %251 : vector<2x128xf32>
    %253 = math.tanh %247 : vector<2x128xf32>
    %254 = vector.extract_strided_slice %252 {offsets = [0, 0], sizes = [2, 10], strides = [1, 1]} : vector<2x128xf32> to vector<2x10xf32>
    %255 = vector.extract_strided_slice %252 {offsets = [0, 10], sizes = [2, 10], strides = [1, 1]} : vector<2x128xf32> to vector<2x10xf32>
    %256 = vector.extract_strided_slice %253 {offsets = [0, 20], sizes = [2, 10], strides = [1, 1]} : vector<2x128xf32> to vector<2x10xf32>
    %257 = vector.extract_strided_slice %252 {offsets = [0, 30], sizes = [2, 10], strides = [1, 1]} : vector<2x128xf32> to vector<2x10xf32>
    %258 = arith.mulf %254, %216 : vector<2x10xf32>
    %259 = arith.mulf %255, %256 : vector<2x10xf32>
    %260 = arith.addf %258, %259 : vector<2x10xf32>
    %261 = math.tanh %260 : vector<2x10xf32>
    %262 = arith.mulf %257, %261 : vector<2x10xf32>
    %263 = arith.truncf %262 : vector<2x10xf32> to vector<2x10xbf16>
    %cst_55 = arith.constant dense<0.000000e+00> : vector<2x128xf32>
    %264 = tpu.matmul %263, %1, %cst_55 {dimension_numbers = #tpu.dot_dimension_numbers<[1], [0], [0], [1], [0, 0, 1, 1], [], []>} : vector<2x10xbf16>, vector<10x128xbf16>, vector<2x128xf32> -> vector<2x128xf32>
    %265 = arith.truncf %239 : vector<2x10xf32> to vector<2x10xbf16>
    %cst_56 = arith.constant dense<0.000000e+00> : vector<2x128xf32>
    %266 = tpu.matmul %265, %2, %cst_56 {dimension_numbers = #tpu.dot_dimension_numbers<[1], [0], [0], [1], [0, 0, 1, 1], [], []>} : vector<2x10xbf16>, vector<10x128xbf16>, vector<2x128xf32> -> vector<2x128xf32>
    %267 = arith.addf %264, %266 : vector<2x128xf32>
    %268 = arith.addf %267, %12 : vector<2x128xf32>
    %269 = arith.negf %268 : vector<2x128xf32>
    %270 = math.exp %269 : vector<2x128xf32>
    %cst_57 = arith.constant 1.000000e+00 : f32
    %271 = vector.broadcast %cst_57 : f32 to vector<2x128xf32>
    %272 = arith.addf %271, %270 : vector<2x128xf32>
    %273 = arith.divf %271, %272 : vector<2x128xf32>
    %274 = math.tanh %268 : vector<2x128xf32>
    %275 = vector.extract_strided_slice %273 {offsets = [0, 0], sizes = [2, 10], strides = [1, 1]} : vector<2x128xf32> to vector<2x10xf32>
    %276 = vector.extract_strided_slice %273 {offsets = [0, 10], sizes = [2, 10], strides = [1, 1]} : vector<2x128xf32> to vector<2x10xf32>
    %277 = vector.extract_strided_slice %274 {offsets = [0, 20], sizes = [2, 10], strides = [1, 1]} : vector<2x128xf32> to vector<2x10xf32>
    %278 = vector.extract_strided_slice %273 {offsets = [0, 30], sizes = [2, 10], strides = [1, 1]} : vector<2x128xf32> to vector<2x10xf32>
    %279 = arith.mulf %275, %237 : vector<2x10xf32>
    %280 = arith.mulf %276, %277 : vector<2x10xf32>
    %281 = arith.addf %279, %280 : vector<2x10xf32>
    %282 = math.tanh %281 : vector<2x10xf32>
    %283 = arith.mulf %278, %282 : vector<2x10xf32>
    %c6 = arith.constant 6 : index
    %c0_58 = arith.constant 0 : index
    %c0_59 = arith.constant 0 : index
    %284 = vector.load %arg0[%c6, %c0_58, %c0_59] : memref<8x2x1xf32, #tpu.memory_space<vmem>>, vector<1x2x1xf32>
    %285 = vector.shape_cast %284 : vector<1x2x1xf32> to vector<2x1xf32>
    %286 = vector.broadcast %285 : vector<2x1xf32> to vector<2x128xf32>
    %287 = arith.mulf %286, %6 : vector<2x128xf32>
    %288 = arith.addf %287, %9 : vector<2x128xf32>
    %289 = arith.truncf %262 : vector<2x10xf32> to vector<2x10xbf16>
    %cst_60 = arith.constant dense<0.000000e+00> : vector<2x128xf32>
    %290 = tpu.matmul %289, %0, %cst_60 {dimension_numbers = #tpu.dot_dimension_numbers<[1], [0], [0], [1], [0, 0, 1, 1], [], []>} : vector<2x10xbf16>, vector<10x128xbf16>, vector<2x128xf32> -> vector<2x128xf32>
    %291 = arith.addf %288, %290 : vector<2x128xf32>
    %292 = arith.negf %291 : vector<2x128xf32>
    %293 = math.exp %292 : vector<2x128xf32>
    %cst_61 = arith.constant 1.000000e+00 : f32
    %294 = vector.broadcast %cst_61 : f32 to vector<2x128xf32>
    %295 = arith.addf %294, %293 : vector<2x128xf32>
    %296 = arith.divf %294, %295 : vector<2x128xf32>
    %297 = math.tanh %291 : vector<2x128xf32>
    %298 = vector.extract_strided_slice %296 {offsets = [0, 0], sizes = [2, 10], strides = [1, 1]} : vector<2x128xf32> to vector<2x10xf32>
    %299 = vector.extract_strided_slice %296 {offsets = [0, 10], sizes = [2, 10], strides = [1, 1]} : vector<2x128xf32> to vector<2x10xf32>
    %300 = vector.extract_strided_slice %297 {offsets = [0, 20], sizes = [2, 10], strides = [1, 1]} : vector<2x128xf32> to vector<2x10xf32>
    %301 = vector.extract_strided_slice %296 {offsets = [0, 30], sizes = [2, 10], strides = [1, 1]} : vector<2x128xf32> to vector<2x10xf32>
    %302 = arith.mulf %298, %260 : vector<2x10xf32>
    %303 = arith.mulf %299, %300 : vector<2x10xf32>
    %304 = arith.addf %302, %303 : vector<2x10xf32>
    %305 = math.tanh %304 : vector<2x10xf32>
    %306 = arith.mulf %301, %305 : vector<2x10xf32>
    %307 = arith.truncf %306 : vector<2x10xf32> to vector<2x10xbf16>
    %cst_62 = arith.constant dense<0.000000e+00> : vector<2x128xf32>
    %308 = tpu.matmul %307, %1, %cst_62 {dimension_numbers = #tpu.dot_dimension_numbers<[1], [0], [0], [1], [0, 0, 1, 1], [], []>} : vector<2x10xbf16>, vector<10x128xbf16>, vector<2x128xf32> -> vector<2x128xf32>
    %309 = arith.truncf %283 : vector<2x10xf32> to vector<2x10xbf16>
    %cst_63 = arith.constant dense<0.000000e+00> : vector<2x128xf32>
    %310 = tpu.matmul %309, %2, %cst_63 {dimension_numbers = #tpu.dot_dimension_numbers<[1], [0], [0], [1], [0, 0, 1, 1], [], []>} : vector<2x10xbf16>, vector<10x128xbf16>, vector<2x128xf32> -> vector<2x128xf32>
    %311 = arith.addf %308, %310 : vector<2x128xf32>
    %312 = arith.addf %311, %12 : vector<2x128xf32>
    %313 = arith.negf %312 : vector<2x128xf32>
    %314 = math.exp %313 : vector<2x128xf32>
    %cst_64 = arith.constant 1.000000e+00 : f32
    %315 = vector.broadcast %cst_64 : f32 to vector<2x128xf32>
    %316 = arith.addf %315, %314 : vector<2x128xf32>
    %317 = arith.divf %315, %316 : vector<2x128xf32>
    %318 = math.tanh %312 : vector<2x128xf32>
    %319 = vector.extract_strided_slice %317 {offsets = [0, 0], sizes = [2, 10], strides = [1, 1]} : vector<2x128xf32> to vector<2x10xf32>
    %320 = vector.extract_strided_slice %317 {offsets = [0, 10], sizes = [2, 10], strides = [1, 1]} : vector<2x128xf32> to vector<2x10xf32>
    %321 = vector.extract_strided_slice %318 {offsets = [0, 20], sizes = [2, 10], strides = [1, 1]} : vector<2x128xf32> to vector<2x10xf32>
    %322 = vector.extract_strided_slice %317 {offsets = [0, 30], sizes = [2, 10], strides = [1, 1]} : vector<2x128xf32> to vector<2x10xf32>
    %323 = arith.mulf %319, %281 : vector<2x10xf32>
    %324 = arith.mulf %320, %321 : vector<2x10xf32>
    %325 = arith.addf %323, %324 : vector<2x10xf32>
    %326 = math.tanh %325 : vector<2x10xf32>
    %327 = arith.mulf %322, %326 : vector<2x10xf32>
    %c7 = arith.constant 7 : index
    %c0_65 = arith.constant 0 : index
    %c0_66 = arith.constant 0 : index
    %328 = vector.load %arg0[%c7, %c0_65, %c0_66] : memref<8x2x1xf32, #tpu.memory_space<vmem>>, vector<1x2x1xf32>
    %329 = vector.shape_cast %328 : vector<1x2x1xf32> to vector<2x1xf32>
    %330 = vector.broadcast %329 : vector<2x1xf32> to vector<2x128xf32>
    %331 = arith.mulf %330, %6 : vector<2x128xf32>
    %332 = arith.addf %331, %9 : vector<2x128xf32>
    %333 = arith.truncf %306 : vector<2x10xf32> to vector<2x10xbf16>
    %cst_67 = arith.constant dense<0.000000e+00> : vector<2x128xf32>
    %334 = tpu.matmul %333, %0, %cst_67 {dimension_numbers = #tpu.dot_dimension_numbers<[1], [0], [0], [1], [0, 0, 1, 1], [], []>} : vector<2x10xbf16>, vector<10x128xbf16>, vector<2x128xf32> -> vector<2x128xf32>
    %335 = arith.addf %332, %334 : vector<2x128xf32>
    %336 = arith.negf %335 : vector<2x128xf32>
    %337 = math.exp %336 : vector<2x128xf32>
    %cst_68 = arith.constant 1.000000e+00 : f32
    %338 = vector.broadcast %cst_68 : f32 to vector<2x128xf32>
    %339 = arith.addf %338, %337 : vector<2x128xf32>
    %340 = arith.divf %338, %339 : vector<2x128xf32>
    %341 = math.tanh %335 : vector<2x128xf32>
    %342 = vector.extract_strided_slice %340 {offsets = [0, 0], sizes = [2, 10], strides = [1, 1]} : vector<2x128xf32> to vector<2x10xf32>
    %343 = vector.extract_strided_slice %340 {offsets = [0, 10], sizes = [2, 10], strides = [1, 1]} : vector<2x128xf32> to vector<2x10xf32>
    %344 = vector.extract_strided_slice %341 {offsets = [0, 20], sizes = [2, 10], strides = [1, 1]} : vector<2x128xf32> to vector<2x10xf32>
    %345 = vector.extract_strided_slice %340 {offsets = [0, 30], sizes = [2, 10], strides = [1, 1]} : vector<2x128xf32> to vector<2x10xf32>
    %346 = arith.mulf %342, %304 : vector<2x10xf32>
    %347 = arith.mulf %343, %344 : vector<2x10xf32>
    %348 = arith.addf %346, %347 : vector<2x10xf32>
    %349 = math.tanh %348 : vector<2x10xf32>
    %350 = arith.mulf %345, %349 : vector<2x10xf32>
    %351 = arith.truncf %350 : vector<2x10xf32> to vector<2x10xbf16>
    %cst_69 = arith.constant dense<0.000000e+00> : vector<2x128xf32>
    %352 = tpu.matmul %351, %1, %cst_69 {dimension_numbers = #tpu.dot_dimension_numbers<[1], [0], [0], [1], [0, 0, 1, 1], [], []>} : vector<2x10xbf16>, vector<10x128xbf16>, vector<2x128xf32> -> vector<2x128xf32>
    %353 = arith.truncf %327 : vector<2x10xf32> to vector<2x10xbf16>
    %cst_70 = arith.constant dense<0.000000e+00> : vector<2x128xf32>
    %354 = tpu.matmul %353, %2, %cst_70 {dimension_numbers = #tpu.dot_dimension_numbers<[1], [0], [0], [1], [0, 0, 1, 1], [], []>} : vector<2x10xbf16>, vector<10x128xbf16>, vector<2x128xf32> -> vector<2x128xf32>
    %355 = arith.addf %352, %354 : vector<2x128xf32>
    %356 = arith.addf %355, %12 : vector<2x128xf32>
    %357 = arith.negf %356 : vector<2x128xf32>
    %358 = math.exp %357 : vector<2x128xf32>
    %cst_71 = arith.constant 1.000000e+00 : f32
    %359 = vector.broadcast %cst_71 : f32 to vector<2x128xf32>
    %360 = arith.addf %359, %358 : vector<2x128xf32>
    %361 = arith.divf %359, %360 : vector<2x128xf32>
    %362 = math.tanh %356 : vector<2x128xf32>
    %363 = vector.extract_strided_slice %361 {offsets = [0, 0], sizes = [2, 10], strides = [1, 1]} : vector<2x128xf32> to vector<2x10xf32>
    %364 = vector.extract_strided_slice %361 {offsets = [0, 10], sizes = [2, 10], strides = [1, 1]} : vector<2x128xf32> to vector<2x10xf32>
    %365 = vector.extract_strided_slice %362 {offsets = [0, 20], sizes = [2, 10], strides = [1, 1]} : vector<2x128xf32> to vector<2x10xf32>
    %366 = vector.extract_strided_slice %361 {offsets = [0, 30], sizes = [2, 10], strides = [1, 1]} : vector<2x128xf32> to vector<2x10xf32>
    %367 = arith.mulf %363, %325 : vector<2x10xf32>
    %368 = arith.mulf %364, %365 : vector<2x10xf32>
    %369 = arith.addf %367, %368 : vector<2x10xf32>
    %370 = math.tanh %369 : vector<2x10xf32>
    %371 = arith.mulf %366, %370 : vector<2x10xf32>
    %372 = arith.truncf %371 : vector<2x10xf32> to vector<2x10xbf16>
    %cst_72 = arith.constant dense<0.000000e+00> : vector<2x128xf32>
    %373 = tpu.matmul %372, %3, %cst_72 {dimension_numbers = #tpu.dot_dimension_numbers<[1], [0], [0], [1], [0, 0, 1, 1], [], []>} : vector<2x10xbf16>, vector<10x128xbf16>, vector<2x128xf32> -> vector<2x128xf32>
    %374 = arith.addf %373, %15 : vector<2x128xf32>
    %375 = vector.extract_strided_slice %374 {offsets = [0, 0], sizes = [2, 1], strides = [1, 1]} : vector<2x128xf32> to vector<2x1xf32>
    %c0_73 = arith.constant 0 : index
    %c0_74 = arith.constant 0 : index
    %376 = vector.load %arg3[%c0_73, %c0_74] : memref<2x1xf32, #tpu.memory_space<vmem>>, vector<2x1xf32>
    tpu.vector_store %arg3[%c0_73, %c0_74], %375 {strides = array<i32>} : memref<2x1xf32, #tpu.memory_space<vmem>>, vector<2x1xf32>,
    return
  }
}

</mosaic_0001>

<bundles_post_ra>
// kernel: lstm_forward.1
= control target key start
LH: loop header
LB: loop body
LE: loop exit
PB: predicated region body
PF: predicated region fallthrough
CT: control target
= control target key end

     0   :  { %vm60_vm0 = vcmask 1044480   ;;  %v2066_v0 = vmov 0.0   ;;  %vm2067_vm1 = vmmov 0   ;;  %v2068_v2 = vmov 0   ;;  %s2069_s20 = smov 118   ;;  %s2070_s25 = smov 30   ;;  %s2427_s1 = inlined_call_operand.vmem [shape: bf16[64,128], index: 1, kind: input, shape index: {}]   ;;  %s2428_s0 = inlined_call_operand.vmem [shape: f32[8,2,1], index: 0, kind: input, shape index: {}]   ;;  %s2429_s2 = inlined_call_operand.vmem [shape: f32[8,128], index: 2, kind: input, shape index: {}]   ;;  %s2430_s3 = inlined_call_operand.vmem [shape: f32[2,1], index: 3, kind: output, shape index: {}]  }
   0x1   :  { %1773 = vmatprep.subr.bf16.mxu0 %v2066_v0  ;;  %v1931_v1 = vld [vmem:[%s2427_s1] sm:$0x1f]   ;;  %1775 = vmatprep.mubr.msk.bf16.mxu0 %vm2067_vm1, %v2066_v0  ;;  %v1932_v25 = vld [vmem:[%s2427_s1 + $0x10] sm:$0x1f]   ;;  %v1933_v26 = vld [vmem:[%s2427_s1 + $0x8] sm:$0x1f]  }
   0x2   :  { %1929 = vset.pattern.permute.xlu0 %v2068_v2  ;;  %v43_v3 = vld [vmem:[%s2428_s0] sm:$0x3]  ;;  %1779 = vmatprep.subr.bf16.mxu1 %v2066_v0  ;;  %v2103_v4 = vsel %vm60_vm0, %v1931_v1, 0  ;;  %v2135_v27 = vsel %vm60_vm0, %v1932_v25, 0  ;;  %v2138_v28 = vsel %vm60_vm0, %v1933_v26, 0  ;;  %s2071_s28 = smov 98  }
   0x3   :  { %46 = vperm.xlu0 %1929, %v43_v3   ;;  %1781 = vmatprep.mubr.msk.bf16.mxu1 %vm2067_vm1, %v2066_v0  ;;  %v2114_v5 = vld [vmem:[%s2429_s2] ss:$0 sm:$0xff]  ;;  %v2120_v8 = vld [vmem:[%s2429_s2 + $0x1] ss:$0 sm:$0xff]  ;;  %v1679_v30 = vld [vmem:[%s2428_s0 + $0x2] sm:$0x3] }
   0x4   :  { %1774 = vmatpush3.bf16.msra.mxu0 %v2103_v4  ;;  %1930 = vset.pattern.permute.xlu1 %v2068_v2  ;;  %vm56_vm2 = vcmask 80896   ;;  %v2168_v42 = vld [vmem:[%s2429_s2 + $0x2] ss:$0 sm:$0xff]  ;;  %vm1663_vm3 = vcmask 1024  }
   0x5   :  { %1785 = vmatprep.subr.bf16.mxu0 %v2066_v0  ;;  %1780 = vmatpush3.bf16.msra.mxu1 %v2135_v27 }
   0x6   :  { %1791 = vmatprep.subr.bf16.mxu1 %v2066_v0 }
   0x7   :  { %1776 = vmatmul.mubr.bf16.vlgmr.msra.gmra.mrb[0].mxu0 %v2068_v2 }
   0x8   :  { %1787 = vmatprep.mubr.msk.bf16.mxu0 %vm2067_vm1, %v2066_v0  ;;  %1786 = vmatpush3.bf16.msra.mxu0 %v2138_v28 }
   0x9   :  { %1797 = vmatprep.subr.bf16.mxu0 %v2066_v0  ;;  %1782 = vmatmul.mubr.bf16.vlgmr.msra.gmra.mrb[0].mxu1 %v2068_v2 }
   0xa   :  { %1792 = vmatpush3.bf16.msra.mxu1 %v2103_v4  ;;  %1793 = vmatprep.mubr.msk.bf16.mxu1 %vm2067_vm1, %v2066_v0 }
   0xb   :  { %1803 = vmatprep.subr.bf16.mxu1 %v2066_v0 }
  0x82   :  { %v47_v6 = vpop.permute.xlu0 %46 }
  0x83   :  { %v49_v7 = vmul.f32 %v2114_v5, %v47_v6 }
  0x85   :  { %v50_v9 = vadd.f32 %v2120_v8, %v49_v7 }
  0xda   :  { %v98_v10 = vpop.f32.mrb[0].mxu0 }
  0xdb   :  { %v104_v11 = vadd.f32 %v98_v10, %v50_v9  ;;  %v1777_v12 = vpop.f32.mrb[1].mxu0 }
  0xdc   :  { %v101_v13 = vpop.f32.mrb[2].mxu0  ;;  %v172_v34 = vpop.f32.mrb[0].mxu1 }
  0xdd   :  { %1935 = vtanh.f32 %v104_v11  ;;  %v1778_v14 = vpop.f32.mrb[3].mxu0  ;;  %v1674_v16 = vmul.f32 -1.442695, %v104_v11  ;;  %v1783_v35 = vpop.f32.mrb[1].mxu1 }
  0xde   :  { %v175_v36 = vpop.f32.mrb[2].mxu1 }
  0xdf   :  { %1937 = vpow2.f32 %v1674_v16  ;;  %v1784_v37 = vpop.f32.mrb[3].mxu1 }
  0xe7   :  { %v1936_v15 = vpop.eup %1935 }
  0xe8   :  { %114 = vrot.lane.b32.xlu0 %v1936_v15, %s2069_s20 }
  0xe9   :  { %v1938_v17 = vpop.eup %1937 }
  0xea   :  { %v108_v18 = vadd.f32 1.0, %v1938_v17 }
  0xec   :  { %1939 = vrcp.f32 %v108_v18 }
  0xf6   :  { %v1940_v19 = vpop.eup %1939 }
  0xf7   :  { %v112_v22 = vmul.f32 0.0, %v1940_v19 }
 0x15a   :  { %v115_v20 = vpop.permute.xlu0 %114 }
 0x15b   :  { %v117_v21 = vmul.f32 %v1940_v19, %v115_v20 }
 0x15d   :  { %119 = vrot.lane.b32.xlu1 %v117_v21, %s2069_s20 }
 0x1cf   :  { %v120_v23 = vpop.permute.xlu1 %119 }
 0x1d0   :  { %v2125_v24 = vadd.f32 %v120_v23, %v112_v22  ;;  %v1685_v22 = vld [vmem:[%s2428_s0 + $0x4] sm:$0x3] }
 0x1d2   :  { %1941 = vtanh.f32 %v2125_v24 }
 0x1dc   :  { %v1942_v29 = vpop.eup %1941 }
 0x1dd   :  { %125 = vrot.lane.b32.xlu1 %v1942_v29, %s2070_s25 }
 0x1e1   :  { %261 = vperm.xlu1 %1930, %v1679_v30  }
 0x24f   :  { %v126_v31 = vpop.permute.xlu1 %125 }
 0x250   :  { %v128_v32 = vmul.f32 %v1940_v19, %v126_v31 }
 0x252   :  { %v129_v33 = vpack.c.bf16 %v128_v32, %v128_v32 }
 0x254   :  { %179 = vrot.lane.b32.xlu0 %v129_v33, %s2071_s28 }
 0x260   :  { %v262_v39 = vpop.permute.xlu1 %261 }
 0x261   :  { %v264_v40 = vmul.f32 %v2114_v5, %v262_v39 }
 0x263   :  { %v265_v41 = vadd.f32 %v2120_v8, %v264_v40 }
 0x2c6   :  { %v180_v38 = vpop.permute.xlu0 %179 }
 0x2c7   :  { %1788 = vmatmul.mubr.msk.bf16.vlgmr.msra.gmra.mrb[4].mxu0 %vm56_vm2, %v180_v38  ;;  %1794 = vmatmul.mubr.msk.bf16.vlgmr.msra.gmra.mrb[4].mxu1 %vm56_vm2, %v180_v38 }
 0x2c8   :  { %1798 = vmatpush3.bf16.msra.mxu0 %v2135_v27  ;;  %1804 = vmatpush3.bf16.msra.mxu1 %v2138_v28 }
 0x2c9   :  { %1805 = vmatprep.mubr.msk.bf16.mxu1 %vm2067_vm1, %v2066_v0  ;;  %1799 = vmatprep.mubr.msk.bf16.mxu0 %vm2067_vm1, %v2066_v0 }
 0x2ca   :  { %1809 = vmatprep.subr.bf16.mxu0 %v2066_v0  ;;  %1815 = vmatprep.subr.bf16.mxu1 %v2066_v0 }
 0x39a   :  { %v226_v43 = vpop.f32.mrb[4].mxu0  ;;  %v300_v44 = vpop.f32.mrb[4].mxu1 }
 0x39b   :  { %v227_v45 = vadd.f32 %v226_v43, %v172_v34  ;;  %v306_v46 = vadd.f32 %v300_v44, %v265_v41  ;;  %v1789_v47 = vpop.f32.mrb[5].mxu0  ;;  %v1795_v48 = vpop.f32.mrb[5].mxu1 }
 0x39c   :  { %v229_v49 = vpop.f32.mrb[6].mxu0  ;;  %v303_v50 = vpop.f32.mrb[6].mxu1 }
 0x39d   :  { %v232_v51 = vadd.f32 %v2168_v42, %v227_v45  ;;  %1943 = vtanh.f32 %v306_v46  ;;  %v1790_v52 = vpop.f32.mrb[7].mxu0  ;;  %v1796_v53 = vpop.f32.mrb[7].mxu1  ;;  %v1681_v56 = vmul.f32 -1.442695, %v306_v46 }
 0x39f   :  { %1945 = vtanh.f32 %v232_v51  ;;  %v1678_v57 = vmul.f32 -1.442695, %v232_v51 }
 0x3a0   :  { %1947 = vpow2.f32 %v1681_v56 }
 0x3a1   :  { %1949 = vpow2.f32 %v1678_v57 }
 0x3a7   :  { %v1944_v54 = vpop.eup %1943 }
 0x3a8   :  { %316 = vrot.lane.b32.xlu1 %v1944_v54, %s2069_s20 }
 0x3a9   :  { %v1946_v55 = vpop.eup %1945 }
 0x3aa   :  { %242 = vrot.lane.b32.xlu0 %v1946_v55, %s2069_s20  ;;  %v1948_v58 = vpop.eup %1947 }
 0x3ab   :  { %v1950_v59 = vpop.eup %1949  ;;  %v310_v60 = vadd.f32 1.0, %v1948_v58 }
 0x3ac   :  { %v236_v61 = vadd.f32 1.0, %v1950_v59 }
 0x3ad   :  { %1951 = vrcp.f32 %v310_v60 }
 0x3ae   :  { %1953 = vrcp.f32 %v236_v61 }
 0x3b7   :  { %v1952_v62 = vpop.eup %1951 }
 0x3b8   :  { %v1954_v2 = vpop.eup %1953  ;;  %v314_v7 = vmul.f32 %v1952_v62, %v2125_v24 }
 0x3b9   :  { %v240_v11 = vmul.f32 0.0, %v1954_v2 }
 0x41a   :  { %v317_v63 = vpop.permute.xlu1 %316 }
 0x41b   :  { %v319_v1 = vmul.f32 %v1952_v62, %v317_v63 }
 0x41c   :  { %v243_v3 = vpop.permute.xlu0 %242 }
 0x41d   :  { %v245_v6 = vmul.f32 %v1954_v2, %v243_v3  ;;  %321 = vrot.lane.b32.xlu1 %v319_v1, %s2069_s20 }
 0x41f   :  { %247 = vrot.lane.b32.xlu0 %v245_v6, %s2069_s20 }
 0x48f   :  { %v322_v9 = vpop.permute.xlu1 %321 }
 0x490   :  { %v2176_v10 = vadd.f32 %v322_v9, %v314_v7 }
 0x491   :  { %v248_v12 = vpop.permute.xlu0 %247 }
 0x492   :  { %1955 = vtanh.f32 %v2176_v10  ;;  %v2179_v13 = vadd.f32 %v248_v12, %v240_v11 }
 0x494   :  { %1957 = vtanh.f32 %v2179_v13 }
 0x49c   :  { %v1956_v14 = vpop.eup %1955 }
 0x49d   :  { %327 = vrot.lane.b32.xlu1 %v1956_v14, %s2070_s25 }
 0x49e   :  { %v1958_v15 = vpop.eup %1957 }
 0x49f   :  { %253 = vrot.lane.b32.xlu0 %v1958_v15, %s2070_s25 }
 0x50f   :  { %v328_v16 = vpop.permute.xlu1 %327 }
 0x510   :  { %v330_v17 = vmul.f32 %v1952_v62, %v328_v16 }
 0x511   :  { %v254_v18 = vpop.permute.xlu0 %253 }
 0x512   :  { %v331_v19 = vpack.c.bf16 %v330_v17, %v330_v17  ;;  %v256_v20 = vmul.f32 %v1954_v2, %v254_v18 }
 0x514   :  { %v332_v21 = vpack.c.bf16 %v256_v20, %v256_v20  ;;  %380 = vrot.lane.b32.xlu1 %v331_v19, %s2071_s28 }
 0x516   :  { %334 = vrot.lane.b32.xlu0 %v332_v21, %s2071_s28 }
 0x51a   :  { %454 = vperm.xlu0 %1929, %v1685_v22  }
 0x586   :  { %v381_v23 = vpop.permute.xlu1 %380 }
 0x587   :  { %1806 = vmatmul.mubr.msk.bf16.vlgmr.msra.gmra.mrb[8].mxu1 %vm56_vm2, %v381_v23 }
 0x588   :  { %v335_v24 = vpop.permute.xlu0 %334  ;;  %1816 = vmatpush3.bf16.msra.mxu1 %v2135_v27  ;;  %1817 = vmatprep.mubr.msk.bf16.mxu1 %vm2067_vm1, %v2066_v0 }
 0x589   :  { %1800 = vmatmul.mubr.msk.bf16.vlgmr.msra.gmra.mrb[8].mxu0 %vm56_vm2, %v335_v24  ;;  %1827 = vmatprep.subr.bf16.mxu1 %v2066_v0 }
 0x58a   :  { %1810 = vmatpush3.bf16.msra.mxu0 %v2103_v4  ;;  %1811 = vmatprep.mubr.msk.bf16.mxu0 %vm2067_vm1, %v2066_v0 }
 0x58b   :  { %1821 = vmatprep.subr.bf16.mxu0 %v2066_v0 }
 0x591   :  { %1812 = vmatmul.mubr.msk.bf16.vlgmr.msra.gmra.mrb[12].mxu0 %vm56_vm2, %v381_v23 }
 0x592   :  { %1822 = vmatpush3.bf16.msra.mxu0 %v2138_v28  ;;  %1823 = vmatprep.mubr.msk.bf16.mxu0 %vm2067_vm1, %v2066_v0 }
 0x593   :  { %1833 = vmatprep.subr.bf16.mxu0 %v2066_v0 }
 0x599   :  { %v455_v26 = vpop.permute.xlu0 %454 }
 0x59a   :  { %v457_v36 = vmul.f32 %v2114_v5, %v455_v26 }
 0x59c   :  { %v458_v39 = vadd.f32 %v2120_v8, %v457_v36 }
 0x65a   :  { %v419_v25 = vpop.f32.mrb[8].mxu1 }
 0x65b   :  { %v1807_v29 = vpop.f32.mrb[9].mxu1 }
 0x65c   :  { %v373_v30 = vpop.f32.mrb[8].mxu0  ;;  %v422_v31 = vpop.f32.mrb[10].mxu1 }
 0x65d   :  { %v420_v32 = vadd.f32 %v419_v25, %v373_v30  ;;  %v1801_v33 = vpop.f32.mrb[9].mxu0  ;;  %v1808_v34 = vpop.f32.mrb[11].mxu1 }
 0x65e   :  { %v376_v35 = vpop.f32.mrb[10].mxu0 }
 0x65f   :  { %v425_v37 = vadd.f32 %v2168_v42, %v420_v32  ;;  %v1802_v38 = vpop.f32.mrb[11].mxu0 }
 0x661   :  { %1959 = vtanh.f32 %v425_v37  ;;  %v1684_v48 = vmul.f32 -1.442695, %v425_v37 }
 0x664   :  { %v493_v40 = vpop.f32.mrb[12].mxu0 }
 0x665   :  { %v499_v41 = vadd.f32 %v493_v40, %v458_v39  ;;  %v1813_v43 = vpop.f32.mrb[13].mxu0 }
 0x666   :  { %v496_v44 = vpop.f32.mrb[14].mxu0 }
 0x667   :  { %1961 = vtanh.f32 %v499_v41  ;;  %v1814_v45 = vpop.f32.mrb[15].mxu0  ;;  %v1687_v49 = vmul.f32 -1.442695, %v499_v41 }
 0x668   :  { %1963 = vpow2.f32 %v1684_v48 }
 0x669   :  { %1965 = vpow2.f32 %v1687_v49 }
 0x66b   :  { %v1960_v46 = vpop.eup %1959 }
 0x66c   :  { %435 = vrot.lane.b32.xlu1 %v1960_v46, %s2069_s20 }
 0x671   :  { %v1962_v47 = vpop.eup %1961 }
 0x672   :  { %509 = vrot.lane.b32.xlu0 %v1962_v47, %s2069_s20  ;;  %v1964_v50 = vpop.eup %1963 }
 0x673   :  { %v429_v51 = vadd.f32 1.0, %v1964_v50  ;;  %v1966_v52 = vpop.eup %1965 }
 0x674   :  { %v503_v53 = vadd.f32 1.0, %v1966_v52 }
 0x675   :  { %1967 = vrcp.f32 %v429_v51 }
 0x676   :  { %1969 = vrcp.f32 %v503_v53 }
 0x67f   :  { %v1968_v54 = vpop.eup %1967 }
 0x680   :  { %v1970_v57 = vpop.eup %1969  ;;  %v433_v60 = vmul.f32 %v1968_v54, %v2179_v13 }
 0x681   :  { %v507_v63 = vmul.f32 %v1970_v57, %v2176_v10  ;;  %v1691_v10 = vld [vmem:[%s2428_s0 + $0x6] sm:$0x3] }
 0x6de   :  { %v436_v55 = vpop.permute.xlu1 %435 }
 0x6df   :  { %v438_v56 = vmul.f32 %v1968_v54, %v436_v55 }
 0x6e1   :  { %440 = vrot.lane.b32.xlu1 %v438_v56, %s2069_s20 }
 0x6e4   :  { %v510_v58 = vpop.permute.xlu0 %509 }
 0x6e5   :  { %v512_v59 = vmul.f32 %v1970_v57, %v510_v58 }
 0x6e7   :  { %514 = vrot.lane.b32.xlu0 %v512_v59, %s2069_s20 }
 0x753   :  { %v441_v61 = vpop.permute.xlu1 %440 }
 0x754   :  { %v2212_v62 = vadd.f32 %v441_v61, %v433_v60 }
 0x756   :  { %1971 = vtanh.f32 %v2212_v62 }
 0x759   :  { %v515_v1 = vpop.permute.xlu0 %514 }
 0x75a   :  { %v2216_v2 = vadd.f32 %v515_v1, %v507_v63 }
 0x75c   :  { %1973 = vtanh.f32 %v2216_v2 }
 0x760   :  { %v1972_v3 = vpop.eup %1971 }
 0x761   :  { %446 = vrot.lane.b32.xlu1 %v1972_v3, %s2070_s25  ;;  %v1697_v3 = vld [vmem:[%s2428_s0 + $0x8] sm:$0x3] }
 0x766   :  { %v1974_v6 = vpop.eup %1973 }
 0x767   :  { %520 = vrot.lane.b32.xlu0 %v1974_v6, %s2070_s25 }
 0x7d3   :  { %v447_v7 = vpop.permute.xlu1 %446 }
 0x7d4   :  { %v449_v9 = vmul.f32 %v1968_v54, %v447_v7 }
 0x7d6   :  { %v525_v11 = vpack.c.bf16 %v449_v9, %v449_v9 }
 0x7d8   :  { %527 = vrot.lane.b32.xlu1 %v525_v11, %s2071_s28 }
 0x7d9   :  { %v521_v12 = vpop.permute.xlu0 %520 }
 0x7da   :  { %v523_v13 = vmul.f32 %v1970_v57, %v521_v12 }
 0x7dc   :  { %v524_v14 = vpack.c.bf16 %v523_v13, %v523_v13  ;;  %647 = vperm.xlu1 %1930, %v1691_v10  }
 0x7de   :  { %573 = vrot.lane.b32.xlu0 %v524_v14, %s2071_s28 }
 0x84a   :  { %v528_v15 = vpop.permute.xlu1 %527 }
 0x84b   :  { %1818 = vmatmul.mubr.msk.bf16.vlgmr.msra.gmra.mrb[12].mxu1 %vm56_vm2, %v528_v15 }
 0x84c   :  { %1828 = vmatpush3.bf16.msra.mxu1 %v2103_v4  ;;  %1829 = vmatprep.mubr.msk.bf16.mxu1 %vm2067_vm1, %v2066_v0 }
 0x84d   :  { %1839 = vmatprep.subr.bf16.mxu1 %v2066_v0 }
 0x850   :  { %v574_v16 = vpop.permute.xlu0 %573 }
 0x851   :  { %1824 = vmatmul.mubr.msk.bf16.vlgmr.msra.gmra.mrb[16].mxu0 %vm56_vm2, %v574_v16 }
 0x852   :  { %1834 = vmatpush3.bf16.msra.mxu0 %v2135_v27  ;;  %1835 = vmatprep.mubr.msk.bf16.mxu0 %vm2067_vm1, %v2066_v0 }
 0x853   :  { %1830 = vmatmul.mubr.msk.bf16.vlgmr.msra.gmra.mrb[16].mxu1 %vm56_vm2, %v574_v16  ;;  %1845 = vmatprep.subr.bf16.mxu0 %v2066_v0 }
 0x854   :  { %1840 = vmatpush3.bf16.msra.mxu1 %v2138_v28  ;;  %1841 = vmatprep.mubr.msk.bf16.mxu1 %vm2067_vm1, %v2066_v0 }
 0x855   :  { %1851 = vmatprep.subr.bf16.mxu1 %v2066_v0 }
 0x85b   :  { %v648_v17 = vpop.permute.xlu1 %647 }
 0x85c   :  { %v650_v21 = vmul.f32 %v2114_v5, %v648_v17 }
 0x85e   :  { %v651_v26 = vadd.f32 %v2120_v8, %v650_v21 }
 0x91e   :  { %v566_v18 = vpop.f32.mrb[12].mxu1 }
 0x91f   :  { %v1819_v19 = vpop.f32.mrb[13].mxu1 }
 0x920   :  { %v569_v20 = vpop.f32.mrb[14].mxu1 }
 0x921   :  { %v1820_v22 = vpop.f32.mrb[15].mxu1 }
 0x924   :  { %v612_v23 = vpop.f32.mrb[16].mxu0 }
 0x925   :  { %v613_v24 = vadd.f32 %v612_v23, %v566_v18  ;;  %v1825_v25 = vpop.f32.mrb[17].mxu0 }
 0x926   :  { %v615_v29 = vpop.f32.mrb[18].mxu0  ;;  %v686_v30 = vpop.f32.mrb[16].mxu1 }
 0x927   :  { %v618_v31 = vadd.f32 %v2168_v42, %v613_v24  ;;  %v692_v32 = vadd.f32 %v686_v30, %v651_v26  ;;  %v1826_v33 = vpop.f32.mrb[19].mxu0  ;;  %v1831_v34 = vpop.f32.mrb[17].mxu1 }
 0x928   :  { %v689_v35 = vpop.f32.mrb[18].mxu1 }
 0x929   :  { %1975 = vtanh.f32 %v618_v31  ;;  %v1832_v36 = vpop.f32.mrb[19].mxu1  ;;  %v1690_v39 = vmul.f32 -1.442695, %v618_v31  ;;  %v1693_v40 = vmul.f32 -1.442695, %v692_v32 }
 0x92a   :  { %1977 = vtanh.f32 %v692_v32 }
 0x92b   :  { %1979 = vpow2.f32 %v1690_v39 }
 0x92c   :  { %1981 = vpow2.f32 %v1693_v40 }
 0x933   :  { %v1976_v37 = vpop.eup %1975 }
 0x934   :  { %v1978_v38 = vpop.eup %1977  ;;  %628 = vrot.lane.b32.xlu0 %v1976_v37, %s2069_s20 }
 0x935   :  { %702 = vrot.lane.b32.xlu1 %v1978_v38, %s2069_s20  ;;  %v1980_v41 = vpop.eup %1979 }
 0x936   :  { %v1982_v43 = vpop.eup %1981  ;;  %v622_v44 = vadd.f32 1.0, %v1980_v41 }
 0x937   :  { %v696_v45 = vadd.f32 1.0, %v1982_v43 }
 0x938   :  { %1983 = vrcp.f32 %v622_v44 }
 0x939   :  { %1985 = vrcp.f32 %v696_v45 }
 0x942   :  { %v1984_v46 = vpop.eup %1983 }
 0x943   :  { %v1986_v48 = vpop.eup %1985  ;;  %v626_v52 = vmul.f32 %v1984_v46, %v2212_v62 }
 0x944   :  { %v700_v54 = vmul.f32 %v1986_v48, %v2216_v2 }
 0x9a6   :  { %v629_v47 = vpop.permute.xlu0 %628 }
 0x9a7   :  { %v631_v49 = vmul.f32 %v1984_v46, %v629_v47  ;;  %v703_v50 = vpop.permute.xlu1 %702 }
 0x9a8   :  { %v705_v51 = vmul.f32 %v1986_v48, %v703_v50 }
 0x9a9   :  { %633 = vrot.lane.b32.xlu0 %v631_v49, %s2069_s20 }
 0x9aa   :  { %707 = vrot.lane.b32.xlu1 %v705_v51, %s2069_s20 }
 0xa1b   :  { %v634_v53 = vpop.permute.xlu0 %633 }
 0xa1c   :  { %v2250_v55 = vadd.f32 %v634_v53, %v626_v52  ;;  %v708_v56 = vpop.permute.xlu1 %707 }
 0xa1d   :  { %v2252_v57 = vadd.f32 %v708_v56, %v700_v54 }
 0xa1e   :  { %1987 = vtanh.f32 %v2250_v55 }
 0xa1f   :  { %1989 = vtanh.f32 %v2252_v57 }
 0xa28   :  { %v1988_v58 = vpop.eup %1987 }
 0xa29   :  { %v1990_v59 = vpop.eup %1989  ;;  %639 = vrot.lane.b32.xlu0 %v1988_v58, %s2070_s25 }
 0xa2a   :  { %713 = vrot.lane.b32.xlu1 %v1990_v59, %s2070_s25 }
 0xa9b   :  { %v640_v60 = vpop.permute.xlu0 %639 }
 0xa9c   :  { %v642_v61 = vmul.f32 %v1984_v46, %v640_v60  ;;  %v714_v62 = vpop.permute.xlu1 %713 }
 0xa9d   :  { %v716_v63 = vmul.f32 %v1986_v48, %v714_v62 }
 0xa9e   :  { %v718_v1 = vpack.c.bf16 %v642_v61, %v642_v61 }
 0xa9f   :  { %v717_v2 = vpack.c.bf16 %v716_v63, %v716_v63 }
 0xaa0   :  { %720 = vrot.lane.b32.xlu0 %v718_v1, %s2071_s28 }
 0xaa1   :  { %766 = vrot.lane.b32.xlu1 %v717_v2, %s2071_s28 }
 0xaa4   :  { %840 = vperm.xlu0 %1929, %v1697_v3  }
 0xb12   :  { %v721_v6 = vpop.permute.xlu0 %720 }
 0xb13   :  { %v767_v7 = vpop.permute.xlu1 %766  ;;  %1836 = vmatmul.mubr.msk.bf16.vlgmr.msra.gmra.mrb[20].mxu0 %vm56_vm2, %v721_v6 }
 0xb14   :  { %1842 = vmatmul.mubr.msk.bf16.vlgmr.msra.gmra.mrb[20].mxu1 %vm56_vm2, %v767_v7  ;;  %1846 = vmatpush3.bf16.msra.mxu0 %v2103_v4 }
 0xb15   :  { %1847 = vmatprep.mubr.msk.bf16.mxu0 %vm2067_vm1, %v2066_v0  ;;  %1852 = vmatpush3.bf16.msra.mxu1 %v2135_v27 }
 0xb16   :  { %1857 = vmatprep.subr.bf16.mxu0 %v2066_v0  ;;  %1853 = vmatprep.mubr.msk.bf16.mxu1 %vm2067_vm1, %v2066_v0 }
 0xb17   :  { %1863 = vmatprep.subr.bf16.mxu1 %v2066_v0 }
 0xb1b   :  { %1848 = vmatmul.mubr.msk.bf16.vlgmr.msra.gmra.mrb[24].mxu0 %vm56_vm2, %v767_v7 }
 0xb1c   :  { %1858 = vmatpush3.bf16.msra.mxu0 %v2138_v28  ;;  %1859 = vmatprep.mubr.msk.bf16.mxu0 %vm2067_vm1, %v2066_v0 }
 0xb1d   :  { %1869 = vmatprep.subr.bf16.mxu0 %v2066_v0 }
 0xb23   :  { %v841_v9 = vpop.permute.xlu0 %840 }
 0xb24   :  { %v843_v16 = vmul.f32 %v2114_v5, %v841_v9 }
 0xb26   :  { %v844_v21 = vadd.f32 %v2120_v8, %v843_v16 }
 0xbe6   :  { %v759_v11 = vpop.f32.mrb[20].mxu0 }
 0xbe7   :  { %v805_v12 = vpop.f32.mrb[20].mxu1  ;;  %v1837_v10 = vpop.f32.mrb[21].mxu0 }
 0xbe8   :  { %v806_v13 = vadd.f32 %v805_v12, %v759_v11  ;;  %v1843_v14 = vpop.f32.mrb[21].mxu1  ;;  %v762_v15 = vpop.f32.mrb[22].mxu0 }
 0xbe9   :  { %v808_v17 = vpop.f32.mrb[22].mxu1  ;;  %v1838_v18 = vpop.f32.mrb[23].mxu0 }
 0xbea   :  { %v811_v19 = vadd.f32 %v2168_v42, %v806_v13  ;;  %v1844_v20 = vpop.f32.mrb[23].mxu1 }
 0xbec   :  { %1991 = vtanh.f32 %v811_v19  ;;  %v1696_v31 = vmul.f32 -1.442695, %v811_v19 }
 0xbee   :  { %v879_v22 = vpop.f32.mrb[24].mxu0 }
 0xbef   :  { %v885_v23 = vadd.f32 %v879_v22, %v844_v21  ;;  %v1849_v24 = vpop.f32.mrb[25].mxu0 }
 0xbf0   :  { %v882_v25 = vpop.f32.mrb[26].mxu0 }
 0xbf1   :  { %1993 = vtanh.f32 %v885_v23  ;;  %v1850_v26 = vpop.f32.mrb[27].mxu0  ;;  %v1699_v32 = vmul.f32 -1.442695, %v885_v23 }
 0xbf2   :  { %1995 = vpow2.f32 %v1696_v31 }
 0xbf3   :  { %1997 = vpow2.f32 %v1699_v32 }
 0xbf6   :  { %v1992_v29 = vpop.eup %1991 }
 0xbf7   :  { %821 = vrot.lane.b32.xlu1 %v1992_v29, %s2069_s20 }
 0xbfb   :  { %v1994_v30 = vpop.eup %1993 }
 0xbfc   :  { %895 = vrot.lane.b32.xlu0 %v1994_v30, %s2069_s20  ;;  %v1996_v33 = vpop.eup %1995 }
 0xbfd   :  { %v815_v34 = vadd.f32 1.0, %v1996_v33  ;;  %v1998_v35 = vpop.eup %1997 }
 0xbfe   :  { %v889_v36 = vadd.f32 1.0, %v1998_v35 }
 0xbff   :  { %1999 = vrcp.f32 %v815_v34 }
 0xc00   :  { %2001 = vrcp.f32 %v889_v36 }
 0xc09   :  { %v2000_v37 = vpop.eup %1999 }
 0xc0a   :  { %v2002_v40 = vpop.eup %2001  ;;  %v819_v44 = vmul.f32 %v2000_v37, %v2250_v55 }
 0xc0b   :  { %v893_v47 = vmul.f32 %v2002_v40, %v2252_v57  ;;  %v1703_v57 = vld [vmem:[%s2428_s0 + $0xa] sm:$0x3] }
 0xc69   :  { %v822_v38 = vpop.permute.xlu1 %821 }
 0xc6a   :  { %v824_v39 = vmul.f32 %v2000_v37, %v822_v38 }
 0xc6c   :  { %826 = vrot.lane.b32.xlu1 %v824_v39, %s2069_s20 }
 0xc6e   :  { %v896_v41 = vpop.permute.xlu0 %895 }
 0xc6f   :  { %v898_v43 = vmul.f32 %v2002_v40, %v896_v41 }
 0xc71   :  { %900 = vrot.lane.b32.xlu0 %v898_v43, %s2069_s20 }
 0xcde   :  { %v827_v45 = vpop.permute.xlu1 %826 }
 0xcdf   :  { %v2286_v46 = vadd.f32 %v827_v45, %v819_v44 }
 0xce1   :  { %2003 = vtanh.f32 %v2286_v46 }
 0xce3   :  { %v901_v48 = vpop.permute.xlu0 %900 }
 0xce4   :  { %v2290_v49 = vadd.f32 %v901_v48, %v893_v47 }
 0xce6   :  { %2005 = vtanh.f32 %v2290_v49 }
 0xceb   :  { %v2004_v50 = vpop.eup %2003 }
 0xcec   :  { %832 = vrot.lane.b32.xlu1 %v2004_v50, %s2070_s25  ;;  %v1709_v50 = vld [vmem:[%s2428_s0 + $0xc] sm:$0x3] }
 0xcf0   :  { %v2006_v51 = vpop.eup %2005 }
 0xcf1   :  { %906 = vrot.lane.b32.xlu0 %v2006_v51, %s2070_s25 }
 0xd5e   :  { %v833_v52 = vpop.permute.xlu1 %832 }
 0xd5f   :  { %v835_v53 = vmul.f32 %v2000_v37, %v833_v52 }
 0xd61   :  { %v911_v54 = vpack.c.bf16 %v835_v53, %v835_v53 }
 0xd63   :  { %913 = vrot.lane.b32.xlu1 %v911_v54, %s2071_s28  ;;  %v907_v55 = vpop.permute.xlu0 %906 }
 0xd64   :  { %v909_v56 = vmul.f32 %v2002_v40, %v907_v55 }
 0xd66   :  { %v910_v58 = vpack.c.bf16 %v909_v56, %v909_v56 }
 0xd67   :  { %1033 = vperm.xlu1 %1930, %v1703_v57  }
 0xd68   :  { %959 = vrot.lane.b32.xlu0 %v910_v58, %s2071_s28 }
 0xdd5   :  { %v914_v59 = vpop.permute.xlu1 %913 }
 0xdd6   :  { %1854 = vmatmul.mubr.msk.bf16.vlgmr.msra.gmra.mrb[24].mxu1 %vm56_vm2, %v914_v59 }
 0xdd7   :  { %1864 = vmatpush3.bf16.msra.mxu1 %v2103_v4  ;;  %1865 = vmatprep.mubr.msk.bf16.mxu1 %vm2067_vm1, %v2066_v0 }
 0xdd8   :  { %1875 = vmatprep.subr.bf16.mxu1 %v2066_v0 }
 0xdda   :  { %v960_v60 = vpop.permute.xlu0 %959 }
 0xddb   :  { %1860 = vmatmul.mubr.msk.bf16.vlgmr.msra.gmra.mrb[28].mxu0 %vm56_vm2, %v960_v60 }
 0xddc   :  { %1870 = vmatpush3.bf16.msra.mxu0 %v2135_v27  ;;  %1871 = vmatprep.mubr.msk.bf16.mxu0 %vm2067_vm1, %v2066_v0 }
 0xddd   :  { %1881 = vmatprep.subr.bf16.mxu0 %v2066_v0 }
 0xdde   :  { %1866 = vmatmul.mubr.msk.bf16.vlgmr.msra.gmra.mrb[28].mxu1 %vm56_vm2, %v960_v60 }
 0xddf   :  { %1876 = vmatpush3.bf16.msra.mxu1 %v2138_v28  ;;  %1877 = vmatprep.mubr.msk.bf16.mxu1 %vm2067_vm1, %v2066_v0 }
 0xde0   :  { %1887 = vmatprep.subr.bf16.mxu1 %v2066_v0 }
 0xde6   :  { %v1034_v61 = vpop.permute.xlu1 %1033 }
 0xde7   :  { %v1036_v2 = vmul.f32 %v2114_v5, %v1034_v61 }
 0xde9   :  { %v1037_v12 = vadd.f32 %v2120_v8, %v1036_v2 }
 0xea9   :  { %v952_v62 = vpop.f32.mrb[24].mxu1 }
 0xeaa   :  { %v1855_v63 = vpop.f32.mrb[25].mxu1 }
 0xeab   :  { %v955_v1 = vpop.f32.mrb[26].mxu1 }
 0xeac   :  { %v1856_v3 = vpop.f32.mrb[27].mxu1 }
 0xeae   :  { %v998_v6 = vpop.f32.mrb[28].mxu0 }
 0xeaf   :  { %v999_v7 = vadd.f32 %v998_v6, %v952_v62  ;;  %v1861_v9 = vpop.f32.mrb[29].mxu0 }
 0xeb0   :  { %v1001_v11 = vpop.f32.mrb[30].mxu0 }
 0xeb1   :  { %v1004_v10 = vadd.f32 %v2168_v42, %v999_v7  ;;  %v1072_v13 = vpop.f32.mrb[28].mxu1  ;;  %v1862_v14 = vpop.f32.mrb[31].mxu0 }
 0xeb2   :  { %v1078_v15 = vadd.f32 %v1072_v13, %v1037_v12  ;;  %v1867_v16 = vpop.f32.mrb[29].mxu1 }
 0xeb3   :  { %2007 = vtanh.f32 %v1004_v10  ;;  %v1075_v17 = vpop.f32.mrb[30].mxu1  ;;  %v1702_v21 = vmul.f32 -1.442695, %v1004_v10 }
 0xeb4   :  { %2009 = vtanh.f32 %v1078_v15  ;;  %v1868_v18 = vpop.f32.mrb[31].mxu1  ;;  %v1705_v22 = vmul.f32 -1.442695, %v1078_v15 }
 0xeb5   :  { %2011 = vpow2.f32 %v1702_v21 }
 0xeb6   :  { %2013 = vpow2.f32 %v1705_v22 }
 0xebd   :  { %v2008_v19 = vpop.eup %2007 }
 0xebe   :  { %v2010_v20 = vpop.eup %2009  ;;  %1014 = vrot.lane.b32.xlu0 %v2008_v19, %s2069_s20 }
 0xebf   :  { %1088 = vrot.lane.b32.xlu1 %v2010_v20, %s2069_s20  ;;  %v2012_v23 = vpop.eup %2011 }
 0xec0   :  { %v2014_v24 = vpop.eup %2013  ;;  %v1008_v25 = vadd.f32 1.0, %v2012_v23 }
 0xec1   :  { %v1082_v26 = vadd.f32 1.0, %v2014_v24 }
 0xec2   :  { %2015 = vrcp.f32 %v1008_v25 }
 0xec3   :  { %2017 = vrcp.f32 %v1082_v26 }
 0xecc   :  { %v2016_v29 = vpop.eup %2015 }
 0xecd   :  { %v2018_v31 = vpop.eup %2017  ;;  %v1012_v35 = vmul.f32 %v2016_v29, %v2286_v46 }
 0xece   :  { %v1086_v37 = vmul.f32 %v2018_v31, %v2290_v49 }
 0xf30   :  { %v1015_v30 = vpop.permute.xlu0 %1014 }
 0xf31   :  { %v1017_v32 = vmul.f32 %v2016_v29, %v1015_v30  ;;  %v1089_v33 = vpop.permute.xlu1 %1088 }
 0xf32   :  { %v1091_v34 = vmul.f32 %v2018_v31, %v1089_v33 }
 0xf33   :  { %1019 = vrot.lane.b32.xlu0 %v1017_v32, %s2069_s20 }
 0xf34   :  { %1093 = vrot.lane.b32.xlu1 %v1091_v34, %s2069_s20 }
 0xfa5   :  { %v1020_v36 = vpop.permute.xlu0 %1019 }
 0xfa6   :  { %v2324_v38 = vadd.f32 %v1020_v36, %v1012_v35  ;;  %v1094_v39 = vpop.permute.xlu1 %1093 }
 0xfa7   :  { %v2326_v40 = vadd.f32 %v1094_v39, %v1086_v37 }
 0xfa8   :  { %2019 = vtanh.f32 %v2324_v38 }
 0xfa9   :  { %2021 = vtanh.f32 %v2326_v40 }
 0xfb2   :  { %v2020_v41 = vpop.eup %2019 }
 0xfb3   :  { %v2022_v43 = vpop.eup %2021  ;;  %1025 = vrot.lane.b32.xlu0 %v2020_v41, %s2070_s25 }
 0xfb4   :  { %1099 = vrot.lane.b32.xlu1 %v2022_v43, %s2070_s25 }
0x1025   :  { %v1026_v44 = vpop.permute.xlu0 %1025 }
0x1026   :  { %v1028_v45 = vmul.f32 %v2016_v29, %v1026_v44  ;;  %v1100_v46 = vpop.permute.xlu1 %1099 }
0x1027   :  { %v1102_v47 = vmul.f32 %v2018_v31, %v1100_v46 }
0x1028   :  { %v1104_v48 = vpack.c.bf16 %v1028_v45, %v1028_v45 }
0x1029   :  { %v1103_v49 = vpack.c.bf16 %v1102_v47, %v1102_v47 }
0x102a   :  { %1106 = vrot.lane.b32.xlu0 %v1104_v48, %s2071_s28 }
0x102b   :  { %1152 = vrot.lane.b32.xlu1 %v1103_v49, %s2071_s28 }
0x102e   :  { %1226 = vperm.xlu0 %1929, %v1709_v50  }
0x109c   :  { %v1107_v51 = vpop.permute.xlu0 %1106 }
0x109d   :  { %v1153_v52 = vpop.permute.xlu1 %1152  ;;  %1872 = vmatmul.mubr.msk.bf16.vlgmr.msra.gmra.mrb[32].mxu0 %vm56_vm2, %v1107_v51 }
0x109e   :  { %1878 = vmatmul.mubr.msk.bf16.vlgmr.msra.gmra.mrb[32].mxu1 %vm56_vm2, %v1153_v52  ;;  %1882 = vmatpush3.bf16.msra.mxu0 %v2103_v4 }
0x109f   :  { %1883 = vmatprep.mubr.msk.bf16.mxu0 %vm2067_vm1, %v2066_v0  ;;  %1888 = vmatpush3.bf16.msra.mxu1 %v2135_v27 }
0x10a0   :  { %1893 = vmatprep.subr.bf16.mxu0 %v2066_v0  ;;  %1889 = vmatprep.mubr.msk.bf16.mxu1 %vm2067_vm1, %v2066_v0 }
0x10a1   :  { %1899 = vmatprep.subr.bf16.mxu1 %v2066_v0 }
0x10a5   :  { %1884 = vmatmul.mubr.msk.bf16.vlgmr.msra.gmra.mrb[36].mxu0 %vm56_vm2, %v1153_v52 }
0x10a6   :  { %1894 = vmatpush3.bf16.msra.mxu0 %v2138_v28  ;;  %1895 = vmatprep.mubr.msk.bf16.mxu0 %vm2067_vm1, %v2066_v0 }
0x10a7   :  { %1905 = vmatprep.subr.bf16.mxu0 %v2066_v0 }
0x10ad   :  { %v1227_v53 = vpop.permute.xlu0 %1226 }
0x10ae   :  { %v1229_v60 = vmul.f32 %v2114_v5, %v1227_v53 }
0x10b0   :  { %v1230_v2 = vadd.f32 %v2120_v8, %v1229_v60 }
0x1170   :  { %v1145_v54 = vpop.f32.mrb[32].mxu0 }
0x1171   :  { %v1191_v55 = vpop.f32.mrb[32].mxu1  ;;  %v1873_v56 = vpop.f32.mrb[33].mxu0 }
0x1172   :  { %v1192_v57 = vadd.f32 %v1191_v55, %v1145_v54  ;;  %v1879_v58 = vpop.f32.mrb[33].mxu1  ;;  %v1148_v59 = vpop.f32.mrb[34].mxu0 }
0x1173   :  { %v1194_v61 = vpop.f32.mrb[34].mxu1  ;;  %v1874_v62 = vpop.f32.mrb[35].mxu0 }
0x1174   :  { %v1197_v63 = vadd.f32 %v2168_v42, %v1192_v57  ;;  %v1880_v1 = vpop.f32.mrb[35].mxu1 }
0x1176   :  { %2023 = vtanh.f32 %v1197_v63  ;;  %v1708_v5 = vmul.f32 -1.442695, %v1197_v63 }
0x1178   :  { %v1265_v3 = vpop.f32.mrb[36].mxu0 }
0x1179   :  { %v1271_v6 = vadd.f32 %v1265_v3, %v1230_v2  ;;  %v1885_v7 = vpop.f32.mrb[37].mxu0 }
0x117a   :  { %v1268_v9 = vpop.f32.mrb[38].mxu0 }
0x117b   :  { %2025 = vtanh.f32 %v1271_v6  ;;  %v1886_v11 = vpop.f32.mrb[39].mxu0  ;;  %v1711_v13 = vmul.f32 -1.442695, %v1271_v6 }
0x117c   :  { %2027 = vpow2.f32 %v1708_v5 }
0x117d   :  { %2029 = vpow2.f32 %v1711_v13 }
0x1180   :  { %v2024_v12 = vpop.eup %2023 }
0x1181   :  { %1207 = vrot.lane.b32.xlu1 %v2024_v12, %s2069_s20 }
0x1185   :  { %v2026_v10 = vpop.eup %2025 }
0x1186   :  { %1281 = vrot.lane.b32.xlu0 %v2026_v10, %s2069_s20  ;;  %v2028_v14 = vpop.eup %2027 }
0x1187   :  { %v1201_v15 = vadd.f32 1.0, %v2028_v14  ;;  %v2030_v16 = vpop.eup %2029 }
0x1188   :  { %v1275_v8 = vadd.f32 1.0, %v2030_v16 }
0x1189   :  { %2031 = vrcp.f32 %v1201_v15 }
0x118a   :  { %2033 = vrcp.f32 %v1275_v8 }
0x1193   :  { %v2032_v17 = vpop.eup %2031 }
0x1194   :  { %v2034_v20 = vpop.eup %2033  ;;  %v1205_v23 = vmul.f32 %v2032_v17, %v2324_v38  ;;  %v1715_v38 = vld [vmem:[%s2428_s0 + $0xe] sm:$0x3] }
0x1195   :  { %v1279_v26 = vmul.f32 %v2034_v20, %v2326_v40 }
0x11f3   :  { %v1208_v18 = vpop.permute.xlu1 %1207 }
0x11f4   :  { %v1210_v19 = vmul.f32 %v2032_v17, %v1208_v18 }
0x11f6   :  { %1212 = vrot.lane.b32.xlu1 %v1210_v19, %s2069_s20 }
0x11f8   :  { %v1282_v21 = vpop.permute.xlu0 %1281 }
0x11f9   :  { %v1284_v22 = vmul.f32 %v2034_v20, %v1282_v21 }
0x11fb   :  { %1286 = vrot.lane.b32.xlu0 %v1284_v22, %s2069_s20 }
0x1268   :  { %v1213_v24 = vpop.permute.xlu1 %1212 }
0x1269   :  { %v2360_v25 = vadd.f32 %v1213_v24, %v1205_v23 }
0x126b   :  { %2035 = vtanh.f32 %v2360_v25 }
0x126d   :  { %v1287_v29 = vpop.permute.xlu0 %1286 }
0x126e   :  { %v2364_v30 = vadd.f32 %v1287_v29, %v1279_v26 }
0x1270   :  { %2037 = vtanh.f32 %v2364_v30 }
0x1275   :  { %v2036_v31 = vpop.eup %2035 }
0x1276   :  { %1218 = vrot.lane.b32.xlu1 %v2036_v31, %s2070_s25 }
0x127a   :  { %v2038_v32 = vpop.eup %2037 }
0x127b   :  { %1292 = vrot.lane.b32.xlu0 %v2038_v32, %s2070_s25 }
0x12e8   :  { %v1219_v33 = vpop.permute.xlu1 %1218 }
0x12e9   :  { %v1221_v34 = vmul.f32 %v2032_v17, %v1219_v33 }
0x12eb   :  { %v1297_v35 = vpack.c.bf16 %v1221_v34, %v1221_v34 }
0x12ed   :  { %1299 = vrot.lane.b32.xlu1 %v1297_v35, %s2071_s28  ;;  %v1293_v36 = vpop.permute.xlu0 %1292 }
0x12ee   :  { %v1295_v37 = vmul.f32 %v2034_v20, %v1293_v36 }
0x12f0   :  { %v1296_v39 = vpack.c.bf16 %v1295_v37, %v1295_v37  ;;  %v2065_v37 = vld [vmem:[%s2429_s2 + $0x2] ss:$0 sm:$0xff] }
0x12f1   :  { %1419 = vperm.xlu1 %1930, %v1715_v38  }
0x12f2   :  { %1345 = vrot.lane.b32.xlu0 %v1296_v39, %s2071_s28 }
0x135f   :  { %v1300_v40 = vpop.permute.xlu1 %1299 }
0x1360   :  { %1890 = vmatmul.mubr.msk.bf16.vlgmr.msra.gmra.mrb[36].mxu1 %vm56_vm2, %v1300_v40 }
0x1361   :  { %1900 = vmatpush3.bf16.msra.mxu1 %v2103_v4  ;;  %1901 = vmatprep.mubr.msk.bf16.mxu1 %vm2067_vm1, %v2066_v0 }
0x1362   :  { %1911 = vmatprep.subr.bf16.mxu1 %v2066_v0 }
0x1364   :  { %v1346_v41 = vpop.permute.xlu0 %1345 }
0x1365   :  { %1896 = vmatmul.mubr.msk.bf16.vlgmr.msra.gmra.mrb[40].mxu0 %vm56_vm2, %v1346_v41 }
0x1366   :  { %1906 = vmatpush3.bf16.msra.mxu0 %v2135_v27  ;;  %1907 = vmatprep.mubr.msk.bf16.mxu0 %vm2067_vm1, %v2066_v0  ;;  %v2063_v27 = vld [vmem:[%s2429_s2] ss:$0 sm:$0xff] }
0x1367   :  { %1917 = vmatprep.subr.bf16.mxu0 %v2066_v0 }
0x1368   :  { %1902 = vmatmul.mubr.msk.bf16.vlgmr.msra.gmra.mrb[40].mxu1 %vm56_vm2, %v1346_v41 }
0x1369   :  { %1912 = vmatpush3.bf16.msra.mxu1 %v2138_v28  ;;  %1913 = vmatprep.mubr.msk.bf16.mxu1 %vm2067_vm1, %v2066_v0  ;;  %v2064_v28 = vld [vmem:[%s2429_s2 + $0x1] ss:$0 sm:$0xff] }
0x1370   :  { %v1420_v4 = vpop.permute.xlu1 %1419 }
0x1371   :  { %v1422_v46 = vmul.f32 %v2063_v27, %v1420_v4 }
0x1373   :  { %v1423_v52 = vadd.f32 %v2064_v28, %v1422_v46 }
0x1433   :  { %v1338_v43 = vpop.f32.mrb[36].mxu1 }
0x1434   :  { %v1891_v44 = vpop.f32.mrb[37].mxu1 }
0x1435   :  { %v1341_v45 = vpop.f32.mrb[38].mxu1 }
0x1436   :  { %v1892_v47 = vpop.f32.mrb[39].mxu1 }
0x1438   :  { %v1384_v48 = vpop.f32.mrb[40].mxu0 }
0x1439   :  { %v1385_v49 = vadd.f32 %v1384_v48, %v1338_v43  ;;  %v1897_v50 = vpop.f32.mrb[41].mxu0  ;;  %v1934_v48 = vld [vmem:[%s2427_s1 + $0x18] sm:$0x1f]  }
0x143a   :  { %v1387_v51 = vpop.f32.mrb[42].mxu0 }
0x143b   :  { %v1390_v53 = vadd.f32 %v2168_v42, %v1385_v49  ;;  %v1458_v54 = vpop.f32.mrb[40].mxu1  ;;  %v1898_v55 = vpop.f32.mrb[43].mxu0  ;;  %v1621_v49 = vsel %vm60_vm0, %v1934_v48, 0 }
0x143c   :  { %v1464_v56 = vadd.f32 %v1458_v54, %v1423_v52  ;;  %v1903_v57 = vpop.f32.mrb[41].mxu1  ;;  %v1672_v54 = vld [vmem:[%s2429_s2 + $0x3] ss:$0 sm:$0xff] }
0x143d   :  { %2039 = vtanh.f32 %v1390_v53  ;;  %v1461_v58 = vpop.f32.mrb[42].mxu1  ;;  %v1714_v62 = vmul.f32 -1.442695, %v1390_v53 }
0x143e   :  { %2041 = vtanh.f32 %v1464_v56  ;;  %v1904_v59 = vpop.f32.mrb[43].mxu1  ;;  %v1717_v63 = vmul.f32 -1.442695, %v1464_v56 }
0x143f   :  { %2043 = vpow2.f32 %v1714_v62 }
0x1440   :  { %2045 = vpow2.f32 %v1717_v63 }
0x1447   :  { %v2040_v60 = vpop.eup %2039 }
0x1448   :  { %v2042_v61 = vpop.eup %2041  ;;  %1400 = vrot.lane.b32.xlu0 %v2040_v60, %s2069_s20 }
0x1449   :  { %1474 = vrot.lane.b32.xlu1 %v2042_v61, %s2069_s20  ;;  %v2044_v1 = vpop.eup %2043 }
0x144a   :  { %v2046_v42 = vpop.eup %2045  ;;  %v1394_v2 = vadd.f32 1.0, %v2044_v1 }
0x144b   :  { %v1468_v3 = vadd.f32 1.0, %v2046_v42 }
0x144c   :  { %2047 = vrcp.f32 %v1394_v2 }
0x144d   :  { %2049 = vrcp.f32 %v1468_v3 }
0x1456   :  { %v2048_v6 = vpop.eup %2047 }
0x1457   :  { %v2050_v9 = vpop.eup %2049  ;;  %v1398_v5 = vmul.f32 %v2048_v6, %v2360_v25 }
0x1458   :  { %v1472_v14 = vmul.f32 %v2050_v9, %v2364_v30 }
0x14ba   :  { %v1401_v7 = vpop.permute.xlu0 %1400 }
0x14bb   :  { %v1403_v11 = vmul.f32 %v2048_v6, %v1401_v7  ;;  %v1475_v12 = vpop.permute.xlu1 %1474 }
0x14bc   :  { %v1477_v10 = vmul.f32 %v2050_v9, %v1475_v12 }
0x14bd   :  { %1405 = vrot.lane.b32.xlu0 %v1403_v11, %s2069_s20 }
0x14be   :  { %1479 = vrot.lane.b32.xlu1 %v1477_v10, %s2069_s20 }
0x152f   :  { %v1406_v13 = vpop.permute.xlu0 %1405 }
0x1530   :  { %v1408_v15 = vadd.f32 %v1406_v13, %v1398_v5  ;;  %v1480_v16 = vpop.permute.xlu1 %1479 }
0x1531   :  { %v1482_v8 = vadd.f32 %v1480_v16, %v1472_v14 }
0x1532   :  { %2051 = vtanh.f32 %v1408_v15 }
0x1533   :  { %2053 = vtanh.f32 %v1482_v8 }
0x153c   :  { %v2052_v17 = vpop.eup %2051 }
0x153d   :  { %v2054_v18 = vpop.eup %2053  ;;  %1411 = vrot.lane.b32.xlu0 %v2052_v17, %s2070_s25 }
0x153e   :  { %1485 = vrot.lane.b32.xlu1 %v2054_v18, %s2070_s25 }
0x15af   :  { %v1412_v19 = vpop.permute.xlu0 %1411 }
0x15b0   :  { %v1414_v20 = vmul.f32 %v2048_v6, %v1412_v19  ;;  %v1486_v21 = vpop.permute.xlu1 %1485 }
0x15b1   :  { %v1488_v22 = vmul.f32 %v2050_v9, %v1486_v21 }
0x15b2   :  { %v1490_v23 = vpack.c.bf16 %v1414_v20, %v1414_v20 }
0x15b3   :  { %v1489_v24 = vpack.c.bf16 %v1488_v22, %v1488_v22 }
0x15b4   :  { %1492 = vrot.lane.b32.xlu0 %v1490_v23, %s2071_s28 }
0x15b5   :  { %1538 = vrot.lane.b32.xlu1 %v1489_v24, %s2071_s28 }
0x1626   :  { %v1493_v25 = vpop.permute.xlu0 %1492 }
0x1627   :  { %v1539_v26 = vpop.permute.xlu1 %1538  ;;  %1908 = vmatmul.mubr.msk.bf16.vlgmr.msra.gmra.mrb[44].mxu0 %vm56_vm2, %v1493_v25 }
0x1628   :  { %1914 = vmatmul.mubr.msk.bf16.vlgmr.msra.gmra.mrb[44].mxu1 %vm56_vm2, %v1539_v26  ;;  %1919 = vmatprep.mubr.msk.bf16.mxu0 %vm2067_vm1, %v2066_v0 }
0x1629   :  { %1918 = vmatpush3.bf16.msra.mxu0 %v1621_v49 }
0x16fa   :  { %v1531_v29 = vpop.f32.mrb[44].mxu0 }
0x16fb   :  { %v1577_v30 = vpop.f32.mrb[44].mxu1  ;;  %v1909_v31 = vpop.f32.mrb[45].mxu0 }
0x16fc   :  { %v1578_v32 = vadd.f32 %v1577_v30, %v1531_v29  ;;  %v1915_v33 = vpop.f32.mrb[45].mxu1  ;;  %v1534_v34 = vpop.f32.mrb[46].mxu0 }
0x16fd   :  { %v1580_v35 = vpop.f32.mrb[46].mxu1  ;;  %v1910_v36 = vpop.f32.mrb[47].mxu0 }
0x16fe   :  { %v1583_v38 = vadd.f32 %v2065_v37, %v1578_v32  ;;  %v1916_v39 = vpop.f32.mrb[47].mxu1 }
0x1700   :  { %2055 = vtanh.f32 %v1583_v38  ;;  %v1720_v41 = vmul.f32 -1.442695, %v1583_v38 }
0x1702   :  { %2057 = vpow2.f32 %v1720_v41 }
0x170a   :  { %v2056_v40 = vpop.eup %2055 }
0x170b   :  { %1593 = vrot.lane.b32.xlu0 %v2056_v40, %s2069_s20 }
0x170c   :  { %v2058_v0 = vpop.eup %2057 }
0x170d   :  { %v1587_v4 = vadd.f32 1.0, %v2058_v0 }
0x170f   :  { %2059 = vrcp.f32 %v1587_v4 }
0x1719   :  { %v2060_v43 = vpop.eup %2059 }
0x171a   :  { %v1591_v27 = vmul.f32 %v2060_v43, %v1408_v15 }
0x177d   :  { %v1594_v44 = vpop.permute.xlu0 %1593 }
0x177e   :  { %v1596_v45 = vmul.f32 %v2060_v43, %v1594_v44 }
0x1780   :  { %1598 = vrot.lane.b32.xlu1 %v1596_v45, %s2069_s20 }
0x17f2   :  { %v1599_v46 = vpop.permute.xlu1 %1598 }
0x17f3   :  { %v1601_v47 = vadd.f32 %v1599_v46, %v1591_v27 }
0x17f5   :  { %2061 = vtanh.f32 %v1601_v47 }
0x17ff   :  { %v2062_v50 = vpop.eup %2061 }
0x1800   :  { %1604 = vrot.lane.b32.xlu0 %v2062_v50, %s2070_s25 }
0x1872   :  { %v1605_v51 = vpop.permute.xlu0 %1604 }
0x1873   :  { %v1607_v28 = vmul.f32 %v2060_v43, %v1605_v51 }
0x1875   :  { %v1608_v52 = vpack.c.bf16 %v1607_v28, %v1607_v28 }
0x1877   :  { %1610 = vrot.lane.b32.xlu1 %v1608_v52, %s2071_s28 }
0x18e9   :  { %v1611_v53 = vpop.permute.xlu1 %1610 }
0x18ea   :  { %1920 = vmatmul.mubr.msk.bf16.vlgmr.msra.gmra.mrb[48].mxu0 %vm56_vm2, %v1611_v53 }
0x19bd   :  { %v1657_v55 = vpop.f32.mrb[48].mxu0 }
0x19be   :  { %v1658_v56 = vadd.f32 %v1672_v54, %v1657_v55  ;;  %v1921_v57 = vpop.f32.mrb[49].mxu0 }
0x19bf   :  { %v1660_v58 = vpop.f32.mrb[50].mxu0 }
0x19c0   :  { %1664 = vst.msk [vmem:[%s2430_s3] sm:$0x3] %vm1663_vm3, %v1658_v56  ;;  %v1922_v59 = vpop.f32.mrb[51].mxu0 }

</bundles_post_ra>
